<compile_context>
chip_gen: v5e
topology: v5e:2x2
jax: 0.10.0
libtpu: 0.0.40
codegen_flags: <defaults>
</compile_context>

<pallas_src>
import functools

import jax
import jax.numpy as jnp
from jax import lax
from jax.experimental import pallas as pl
from jax.experimental.pallas import tpu as pltpu

LANE = 128   # lane width (last-dim tiling)
SUB = 16     # sublane tile that is free for both f32 (8) and packed bf16 (16)


def _round_up(x, m):
    return (x + m - 1) // m * m


def _bottleneck_kernel(x_ref, w1_ref, s1_ref, b1_ref,
                       w2_ref, s2_ref, b2_ref,
                       w3_ref, s3_ref, b3_ref, o_ref,
                       *, w_valid):
    # x_ref: (nb, H, W, Cin) bf16, W/channels already padded lane/sublane-dense.
    nb, H, W, Cin = x_ref.shape
    Cw = w1_ref.shape[1]
    Cout = w3_ref.shape[1]
    M = nb * H * W                       # W % 16 == 0 => layout-free reshape

    # ---- conv1 (1x1) + bn1 + relu  (bf16 MXU, f32 accumulate) ---------------
    # x is consumed here and re-read from VMEM at the residual add; no f32
    # copy of the input slab is kept live across the whole kernel.
    h1 = jnp.dot(x_ref[...].reshape(M, Cin), w1_ref[...],
                 preferred_element_type=jnp.float32)
    h1 = jnp.maximum(h1 * s1_ref[...] + b1_ref[...], 0.0)        # (M, Cw) f32

    # Flattened-row coordinates for the 3x3 border masks.
    f32 = jnp.float32
    ridx = lax.broadcasted_iota(jnp.int32, (M, 1), 0)
    xpos = lax.rem(ridx, W)
    ypos = lax.rem(lax.div(ridx, W), H)
    y_keep = [(ypos >= 1).astype(f32), None, (ypos <= H - 2).astype(f32)]
    x_keep = [(xpos >= 1).astype(f32), None,
              (xpos <= w_valid - 2).astype(f32)]

    # ---- conv2 (3x3, stride 1, pad 1) + bn2 + relu --------------------------
    # Tap (ky, kx) reads h1 shifted by d = (ky-1)*W + (kx-1) flattened rows
    # (circular pltpu.roll on the sublane axis); the per-tap (M,1) border mask
    # zeroes rows whose tap falls outside the valid image, which also covers
    # image-wrap inside the block and the padded-W columns of h1.
    # The three kx taps per ky are concatenated along K and hit the MXU as one
    # (M, 3*Cw) @ (3*Cw, Cw) matmul.
    acc = None
    for ky in range(3):
        taps = []
        for kx in range(3):
            d = (ky - 1) * W + (kx - 1)
            tap = h1 if d == 0 else pltpu.roll(h1, (-d) % M, 0)
            mask = y_keep[ky]
            if x_keep[kx] is not None:
                mask = x_keep[kx] if mask is None else mask * x_keep[kx]
            if mask is not None:
                tap = tap * mask
            taps.append(tap)
        part = jnp.dot(jnp.concatenate(taps, axis=-1).astype(jnp.bfloat16),
                       w2_ref[ky], preferred_element_type=jnp.float32)
        acc = part if acc is None else acc + part               # init from tap 0
    h2 = jnp.maximum(acc * s2_ref[...] + b2_ref[...], 0.0)       # (M, Cw) f32

    # ---- conv3 (1x1) + bn3, residual add, relu ------------------------------
    h3 = jnp.dot(h2.astype(jnp.bfloat16), w3_ref[...],
                 preferred_element_type=jnp.float32)
    h3 = h3 * s3_ref[...] + b3_ref[...]                          # (M, Cout) f32

    res = x_ref[...].reshape(M, Cin).astype(jnp.float32)         # VMEM re-read
    o_ref[...] = jnp.maximum(h3 + res, 0.0).reshape(nb, H, W, Cout)


def _vmem_limit_bytes():
    """Per-generation scoped-VMEM limit: ~100 MiB on v5e/v6e, ~48 MiB on v7x."""
    cap = 64 * 1024 * 1024          # v7x-safe fallback (smallest VMEM per TC)
    try:
        cap = pltpu.get_tpu_info().vmem_capacity_bytes
    except Exception:
        pass
    return max(32 * 1024 * 1024, min(cap - 16 * 1024 * 1024, 100 * 1024 * 1024))


def _pick_nb(n, rows_per_image, cin_p, cw_p, cout_p, vmem_budget):
    """Images per grid step: biggest block (<= ~4096 rows) that fits the VMEM
    budget, while keeping >=4 grid steps when possible (DMA pipelining + both
    v7x TensorCores) and preferring an even step count."""
    divisors = sorted(d for d in range(1, n + 1) if n % d == 0)

    def fits(nb):
        m = nb * rows_per_image
        weights = 4 * (cin_p * cw_p + 9 * cw_p * cw_p + cw_p * cout_p)  # bf16 x2buf
        io = 4 * m * cin_p + 8 * m * cout_p          # bf16 in + f32 out, x2 buf
        inter = m * (14 * cw_p + 8 * cout_p + 4 * cin_p)   # generous slab estimate
        return weights + io + inter <= vmem_budget

    ok = [d for d in divisors if fits(d) and d * rows_per_image <= 4096] or [1]
    nb = max(ok)
    for min_steps in (4, 2):                 # keep pipelining / both TCs alive
        cand = [d for d in ok if n // d >= min_steps]
        if cand:
            nb = max(cand)
            break
    if (n // nb) % 2:                        # even step count splits across 2 TCs
        evens = [d for d in ok if d <= nb and (n // d) % 2 == 0]
        if evens:
            nb = max(evens)
    return nb


def bottleneck_pallas(x_nhwc, params):
    """x_nhwc: (N, H, W, Cin) float32.  params: dict of folded weights."""
    N, H, W, Cin = x_nhwc.shape
    width = params["w1"].shape[1]
    Cout = params["w3"].shape[1]
    assert Cin == Cout, "identity residual requires inplanes == planes * 4"

    cin_p = _round_up(Cin, LANE)
    cw_p = _round_up(width, LANE)
    cout_p = _round_up(Cout, LANE)
    w_p = _round_up(W, SUB)

    # Pad only when needed (no-op for real ResNet stage shapes).  Padded
    # weight/scale/bias channels are zero so padded output channels stay 0.
    if (w_p, cin_p) != (W, Cin):
        x_nhwc = jnp.pad(x_nhwc,
                         ((0, 0), (0, 0), (0, w_p - W), (0, cin_p - Cin)))
    xp = x_nhwc.astype(jnp.bfloat16)          # bf16 activations at HBM boundary

    def padc(a, r, c):
        return jnp.pad(a, ((0, r - a.shape[0]), (0, c - a.shape[1])))

    w1 = padc(params["w1"], cin_p, cw_p).astype(jnp.bfloat16)
    w3 = padc(params["w3"], cw_p, cout_p).astype(jnp.bfloat16)
    # 3x3 weights: HWIO (3,3,Cin,Cout) -> pad -> K-concat the kx taps per ky
    # row: (3, 3*cw_p, cw_p), so conv2 runs as three K=3*cw_p MXU matmuls.
    w2 = jnp.pad(params["w2_hwio"],
                 ((0, 0), (0, 0), (0, cw_p - width), (0, cw_p - width)))
    w2 = w2.reshape(3, 3 * cw_p, cw_p).astype(jnp.bfloat16)
    s1 = padc(params["s1"], 1, cw_p); b1 = padc(params["b1"], 1, cw_p)
    s2 = padc(params["s2"], 1, cw_p); b2 = padc(params["b2"], 1, cw_p)
    s3 = padc(params["s3"], 1, cout_p); b3 = padc(params["b3"], 1, cout_p)

    vmem_limit = _vmem_limit_bytes()
    nb = _pick_nb(N, H * w_p, cin_p, cw_p, cout_p, int(vmem_limit * 0.8))
    grid = (N // nb,)

    kernel = functools.partial(_bottleneck_kernel, w_valid=W)
    full = lambda shape: pl.BlockSpec(shape, lambda n: tuple(0 for _ in shape))

    out = pl.pallas_call(
        kernel,
        out_shape=jax.ShapeDtypeStruct((N, H, w_p, cout_p), jnp.float32),
        grid=grid,
        in_specs=[
            pl.BlockSpec((nb, H, w_p, cin_p), lambda n: (n, 0, 0, 0)),
            full((cin_p, cw_p)),
            full((1, cw_p)), full((1, cw_p)),
            full((3, 3 * cw_p, cw_p)),
            full((1, cw_p)), full((1, cw_p)),
            full((cw_p, cout_p)),
            full((1, cout_p)), full((1, cout_p)),
        ],
        out_specs=pl.BlockSpec((nb, H, w_p, cout_p), lambda n: (n, 0, 0, 0)),
        compiler_params=pltpu.CompilerParams(
            dimension_semantics=("parallel",),
            vmem_limit_bytes=int(vmem_limit)),
    )(xp, w1, s1, b1, w2, s2, b2, w3, s3, b3)

    if (w_p, cout_p) != (W, Cout):
        out = out[:, :, :W, :Cout]
    return out


def _fold_bn(gamma, beta, mean, var, eps=1e-5):
    scale = gamma / jnp.sqrt(var + eps)
    bias = beta - mean * scale
    return scale[None, :], bias[None, :]


def make_params(key, inplanes, planes):
    """Deterministic parameter init matching Bottleneck(inplanes, planes)."""
    width = planes                      # base_width=64, groups=1 => width=planes
    cout = planes * 4
    ks = jax.random.split(key, 16)

    # conv weights in matmul-friendly layouts: 1x1 -> (Cin, Cout); 3x3 -> HWIO.
    w1 = jax.random.normal(ks[0], (inplanes, width), jnp.float32) * 0.1
    w2_hwio = jax.random.normal(ks[1], (3, 3, width, width), jnp.float32) * 0.1
    w3 = jax.random.normal(ks[2], (width, cout), jnp.float32) * 0.1

    def bn(k1, k2, k3, k4, c):
        gamma = jax.random.uniform(k1, (c,), jnp.float32, 0.5, 1.5)
        beta = jax.random.normal(k2, (c,), jnp.float32) * 0.1
        mean = jax.random.normal(k3, (c,), jnp.float32) * 0.1
        var = jax.random.uniform(k4, (c,), jnp.float32, 0.5, 1.5)
        return gamma, beta, mean, var

    s1, b1 = _fold_bn(*bn(ks[3], ks[4], ks[5], ks[6], width))
    s2, b2 = _fold_bn(*bn(ks[7], ks[8], ks[9], ks[10], width))
    s3, b3 = _fold_bn(*bn(ks[11], ks[12], ks[13], ks[14], cout))

    return {
        "w1": w1, "s1": s1, "b1": b1,
        "w2_hwio": w2_hwio, "s2": s2, "b2": b2,
        "w3": w3, "s3": s3, "b3": b3,
    }


def bottleneck_reference(x_nhwc, params):
    """Pure-JAX f32 reference (NHWC convs) for correctness checking."""
    dn = lax.conv_dimension_numbers(x_nhwc.shape, (1, 1, 1, 1),
                                    ("NHWC", "HWIO", "NHWC"))
    w1 = params["w1"][None, None]
    w3 = params["w3"][None, None]
    relu = lambda t: jnp.maximum(t, 0.0)

    h = lax.conv_general_dilated(x_nhwc, w1, (1, 1), "VALID",
                                 dimension_numbers=dn)
    h = relu(h * params["s1"][0] + params["b1"][0])
    h = lax.conv_general_dilated(h, params["w2_hwio"], (1, 1),
                                 ((1, 1), (1, 1)), dimension_numbers=dn)
    h = relu(h * params["s2"][0] + params["b2"][0])
    h = lax.conv_general_dilated(h, w3, (1, 1), "VALID",
                                 dimension_numbers=dn)
    h = h * params["s3"][0] + params["b3"][0]
    return relu(h + x_nhwc)


if __name__ == "__main__":
    # Bottleneck(inplanes=16, planes=4): width=4, out channels=16 (= inplanes,
    # so the identity shortcut is valid with downsample=None, stride=1).
    N, Cin, H, W = 2, 16, 8, 8
    planes = 4

    key = jax.random.PRNGKey(0)
    kx, kp = jax.random.split(key)
    x_nchw = jax.random.normal(kx, (N, Cin, H, W), jnp.float32)
    params = make_params(kp, Cin, planes)

    # PyTorch input is NCHW; kernel works in NHWC.
    x_nhwc = jnp.transpose(x_nchw, (0, 2, 3, 1))

    out_nhwc = bottleneck_pallas(x_nhwc, params)
    out_nchw = jnp.transpose(out_nhwc, (0, 3, 1, 2))
    jax.block_until_ready(out_nchw)

    ref_nhwc = bottleneck_reference(x_nhwc, params)
    assert out_nhwc.shape == (N, H, W, Cin)
    max_err = float(jnp.max(jnp.abs(out_nhwc - ref_nhwc)))
    # bf16 activations / matmul inputs (f32 accumulate) vs pure-f32 reference.
    assert jnp.allclose(out_nhwc, ref_nhwc, rtol=3e-2, atol=3e-2), max_err

    print("KERNEL_OK")
</pallas_src>

<mosaic_0001>
module attributes {stable_mosaic.version = 11 : i64} {
  func.func @_bottleneck_kernel(%arg0: i32, %arg1: memref<1x8x16x128xbf16, #tpu.memory_space<vmem>>, %arg2: memref<128x128xbf16, #tpu.memory_space<vmem>>, %arg3: memref<1x128xf32, #tpu.memory_space<vmem>>, %arg4: memref<1x128xf32, #tpu.memory_space<vmem>>, %arg5: memref<3x384x128xbf16, #tpu.memory_space<vmem>>, %arg6: memref<1x128xf32, #tpu.memory_space<vmem>>, %arg7: memref<1x128xf32, #tpu.memory_space<vmem>>, %arg8: memref<128x128xbf16, #tpu.memory_space<vmem>>, %arg9: memref<1x128xf32, #tpu.memory_space<vmem>>, %arg10: memref<1x128xf32, #tpu.memory_space<vmem>>, %arg11: memref<1x8x16x128xf32, #tpu.memory_space<vmem>>) attributes {dimension_semantics = [#tpu.dimension_semantics<parallel>], iteration_bounds = array<i64: 2>, scalar_prefetch = 0 : i64, scratch_operands = 0 : i64, tpu.core_type = #tpu.core_type<tc>, window_params = [{transform_indices = @transform_0, window_bounds = array<i64: 1, 8, 16, 128>}, {pipeline_mode = #tpu.pipeline_mode<synchronous>, transform_indices = @transform_1, window_bounds = array<i64: 128, 128>}, {pipeline_mode = #tpu.pipeline_mode<synchronous>, transform_indices = @transform_2, window_bounds = array<i64: 1, 128>}, {pipeline_mode = #tpu.pipeline_mode<synchronous>, transform_indices = @transform_3, window_bounds = array<i64: 1, 128>}, {pipeline_mode = #tpu.pipeline_mode<synchronous>, transform_indices = @transform_4, window_bounds = array<i64: 3, 384, 128>}, {pipeline_mode = #tpu.pipeline_mode<synchronous>, transform_indices = @transform_5, window_bounds = array<i64: 1, 128>}, {pipeline_mode = #tpu.pipeline_mode<synchronous>, transform_indices = @transform_6, window_bounds = array<i64: 1, 128>}, {pipeline_mode = #tpu.pipeline_mode<synchronous>, transform_indices = @transform_7, window_bounds = array<i64: 128, 128>}, {pipeline_mode = #tpu.pipeline_mode<synchronous>, transform_indices = @transform_8, window_bounds = array<i64: 1, 128>}, {pipeline_mode = #tpu.pipeline_mode<synchronous>, transform_indices = @transform_9, window_bounds = array<i64: 1, 128>}, {transform_indices = @transform_10, window_bounds = array<i64: 1, 8, 16, 128>}]} {
    %c0 = arith.constant 0 : index
    %c0_0 = arith.constant 0 : index
    %c0_1 = arith.constant 0 : index
    %c0_2 = arith.constant 0 : index
    %0 = vector.load %arg1[%c0, %c0_0, %c0_1, %c0_2] : memref<1x8x16x128xbf16, #tpu.memory_space<vmem>>, vector<1x8x16x128xbf16>
    %1 = vector.shape_cast %0 : vector<1x8x16x128xbf16> to vector<128x128xbf16>
    %c0_3 = arith.constant 0 : index
    %c0_4 = arith.constant 0 : index
    %2 = vector.load %arg2[%c0_3, %c0_4] : memref<128x128xbf16, #tpu.memory_space<vmem>>, vector<128x128xbf16>
    %cst = arith.constant dense<0.000000e+00> : vector<128x128xf32>
    %3 = tpu.matmul %1, %2, %cst {dimension_numbers = #tpu.dot_dimension_numbers<[1], [0], [0], [1], [0, 0, 1, 1], [], []>} : vector<128x128xbf16>, vector<128x128xbf16>, vector<128x128xf32> -> vector<128x128xf32>
    %c0_5 = arith.constant 0 : index
    %c0_6 = arith.constant 0 : index
    %4 = vector.load %arg3[%c0_5, %c0_6] : memref<1x128xf32, #tpu.memory_space<vmem>>, vector<1x128xf32>
    %5 = vector.broadcast %4 : vector<1x128xf32> to vector<128x128xf32>
    %6 = arith.mulf %3, %5 : vector<128x128xf32>
    %c0_7 = arith.constant 0 : index
    %c0_8 = arith.constant 0 : index
    %7 = vector.load %arg4[%c0_7, %c0_8] : memref<1x128xf32, #tpu.memory_space<vmem>>, vector<1x128xf32>
    %8 = vector.broadcast %7 : vector<1x128xf32> to vector<128x128xf32>
    %9 = arith.addf %6, %8 : vector<128x128xf32>
    %cst_9 = arith.constant 0.000000e+00 : f32
    %10 = vector.broadcast %cst_9 : f32 to vector<128x128xf32>
    %11 = arith.maximumf %9, %10 : vector<128x128xf32>
    %12 = tpu.iota {dimensions = array<i32: 0>} : vector<128x1xi32>
    %c16_i32 = arith.constant 16 : i32
    %13 = vector.broadcast %c16_i32 : i32 to vector<128x1xi32>
    %14 = arith.remsi %12, %13 : vector<128x1xi32>
    %c16_i32_10 = arith.constant 16 : i32
    %15 = vector.broadcast %c16_i32_10 : i32 to vector<128x1xi32>
    %16 = arith.divsi %12, %15 : vector<128x1xi32>
    %c8_i32 = arith.constant 8 : i32
    %17 = vector.broadcast %c8_i32 : i32 to vector<128x1xi32>
    %18 = arith.remsi %16, %17 : vector<128x1xi32>
    %c1_i32 = arith.constant 1 : i32
    %19 = vector.broadcast %c1_i32 : i32 to vector<128x1xi32>
    %20 = arith.cmpi sge, %18, %19 : vector<128x1xi32>
    %21 = arith.extui %20 : vector<128x1xi1> to vector<128x1xi32>
    %22 = arith.sitofp %21 : vector<128x1xi32> to vector<128x1xf32>
    %c6_i32 = arith.constant 6 : i32
    %23 = vector.broadcast %c6_i32 : i32 to vector<128x1xi32>
    %24 = arith.cmpi sle, %18, %23 : vector<128x1xi32>
    %25 = arith.extui %24 : vector<128x1xi1> to vector<128x1xi32>
    %26 = arith.sitofp %25 : vector<128x1xi32> to vector<128x1xf32>
    %c1_i32_11 = arith.constant 1 : i32
    %27 = vector.broadcast %c1_i32_11 : i32 to vector<128x1xi32>
    %28 = arith.cmpi sge, %14, %27 : vector<128x1xi32>
    %29 = arith.extui %28 : vector<128x1xi1> to vector<128x1xi32>
    %30 = arith.sitofp %29 : vector<128x1xi32> to vector<128x1xf32>
    %c6_i32_12 = arith.constant 6 : i32
    %31 = vector.broadcast %c6_i32_12 : i32 to vector<128x1xi32>
    %32 = arith.cmpi sle, %14, %31 : vector<128x1xi32>
    %33 = arith.extui %32 : vector<128x1xi1> to vector<128x1xi32>
    %34 = arith.sitofp %33 : vector<128x1xi32> to vector<128x1xf32>
    %c17_i32 = arith.constant 17 : i32
    %35 = tpu.dynamic_rotate %11 by %c17_i32 dim 0 : vector<128x128xf32>, i32 -> vector<128x128xf32>
    %36 = arith.mulf %22, %30 : vector<128x1xf32>
    %37 = vector.broadcast %36 : vector<128x1xf32> to vector<128x128xf32>
    %38 = arith.mulf %35, %37 : vector<128x128xf32>
    %c16_i32_13 = arith.constant 16 : i32
    %39 = tpu.dynamic_rotate %11 by %c16_i32_13 dim 0 : vector<128x128xf32>, i32 -> vector<128x128xf32>
    %40 = vector.broadcast %22 : vector<128x1xf32> to vector<128x128xf32>
    %41 = arith.mulf %39, %40 : vector<128x128xf32>
    %c15_i32 = arith.constant 15 : i32
    %42 = tpu.dynamic_rotate %11 by %c15_i32 dim 0 : vector<128x128xf32>, i32 -> vector<128x128xf32>
    %43 = arith.mulf %22, %34 : vector<128x1xf32>
    %44 = vector.broadcast %43 : vector<128x1xf32> to vector<128x128xf32>
    %45 = arith.mulf %42, %44 : vector<128x128xf32>
    %46 = tpu.concatenate %38, %41, %45 in 1 : vector<128x128xf32>, vector<128x128xf32>, vector<128x128xf32> -> vector<128x384xf32>
    %47 = arith.truncf %46 : vector<128x384xf32> to vector<128x384xbf16>
    %c0_14 = arith.constant 0 : index
    %c0_15 = arith.constant 0 : index
    %c0_16 = arith.constant 0 : index
    %48 = vector.load %arg5[%c0_14, %c0_15, %c0_16] : memref<3x384x128xbf16, #tpu.memory_space<vmem>>, vector<1x384x128xbf16>
    %49 = vector.shape_cast %48 : vector<1x384x128xbf16> to vector<384x128xbf16>
    %cst_17 = arith.constant dense<0.000000e+00> : vector<128x128xf32>
    %50 = tpu.matmul %47, %49, %cst_17 {dimension_numbers = #tpu.dot_dimension_numbers<[1], [0], [0], [1], [0, 0, 1, 1], [], []>} : vector<128x384xbf16>, vector<384x128xbf16>, vector<128x128xf32> -> vector<128x128xf32>
    %c1_i32_18 = arith.constant 1 : i32
    %51 = tpu.dynamic_rotate %11 by %c1_i32_18 dim 0 : vector<128x128xf32>, i32 -> vector<128x128xf32>
    %52 = vector.broadcast %30 : vector<128x1xf32> to vector<128x128xf32>
    %53 = arith.mulf %51, %52 : vector<128x128xf32>
    %c127_i32 = arith.constant 127 : i32
    %54 = tpu.dynamic_rotate %11 by %c127_i32 dim 0 : vector<128x128xf32>, i32 -> vector<128x128xf32>
    %55 = vector.broadcast %34 : vector<128x1xf32> to vector<128x128xf32>
    %56 = arith.mulf %54, %55 : vector<128x128xf32>
    %57 = tpu.concatenate %53, %11, %56 in 1 : vector<128x128xf32>, vector<128x128xf32>, vector<128x128xf32> -> vector<128x384xf32>
    %58 = arith.truncf %57 : vector<128x384xf32> to vector<128x384xbf16>
    %c1 = arith.constant 1 : index
    %c0_19 = arith.constant 0 : index
    %c0_20 = arith.constant 0 : index
    %59 = vector.load %arg5[%c1, %c0_19, %c0_20] : memref<3x384x128xbf16, #tpu.memory_space<vmem>>, vector<1x384x128xbf16>
    %60 = vector.shape_cast %59 : vector<1x384x128xbf16> to vector<384x128xbf16>
    %cst_21 = arith.constant dense<0.000000e+00> : vector<128x128xf32>
    %61 = tpu.matmul %58, %60, %cst_21 {dimension_numbers = #tpu.dot_dimension_numbers<[1], [0], [0], [1], [0, 0, 1, 1], [], []>} : vector<128x384xbf16>, vector<384x128xbf16>, vector<128x128xf32> -> vector<128x128xf32>
    %62 = arith.addf %50, %61 : vector<128x128xf32>
    %c113_i32 = arith.constant 113 : i32
    %63 = tpu.dynamic_rotate %11 by %c113_i32 dim 0 : vector<128x128xf32>, i32 -> vector<128x128xf32>
    %64 = arith.mulf %26, %30 : vector<128x1xf32>
    %65 = vector.broadcast %64 : vector<128x1xf32> to vector<128x128xf32>
    %66 = arith.mulf %63, %65 : vector<128x128xf32>
    %c112_i32 = arith.constant 112 : i32
    %67 = tpu.dynamic_rotate %11 by %c112_i32 dim 0 : vector<128x128xf32>, i32 -> vector<128x128xf32>
    %68 = vector.broadcast %26 : vector<128x1xf32> to vector<128x128xf32>
    %69 = arith.mulf %67, %68 : vector<128x128xf32>
    %c111_i32 = arith.constant 111 : i32
    %70 = tpu.dynamic_rotate %11 by %c111_i32 dim 0 : vector<128x128xf32>, i32 -> vector<128x128xf32>
    %71 = arith.mulf %26, %34 : vector<128x1xf32>
    %72 = vector.broadcast %71 : vector<128x1xf32> to vector<128x128xf32>
    %73 = arith.mulf %70, %72 : vector<128x128xf32>
    %74 = tpu.concatenate %66, %69, %73 in 1 : vector<128x128xf32>, vector<128x128xf32>, vector<128x128xf32> -> vector<128x384xf32>
    %75 = arith.truncf %74 : vector<128x384xf32> to vector<128x384xbf16>
    %c2 = arith.constant 2 : index
    %c0_22 = arith.constant 0 : index
    %c0_23 = arith.constant 0 : index
    %76 = vector.load %arg5[%c2, %c0_22, %c0_23] : memref<3x384x128xbf16, #tpu.memory_space<vmem>>, vector<1x384x128xbf16>
    %77 = vector.shape_cast %76 : vector<1x384x128xbf16> to vector<384x128xbf16>
    %cst_24 = arith.constant dense<0.000000e+00> : vector<128x128xf32>
    %78 = tpu.matmul %75, %77, %cst_24 {dimension_numbers = #tpu.dot_dimension_numbers<[1], [0], [0], [1], [0, 0, 1, 1], [], []>} : vector<128x384xbf16>, vector<384x128xbf16>, vector<128x128xf32> -> vector<128x128xf32>
    %79 = arith.addf %62, %78 : vector<128x128xf32>
    %c0_25 = arith.constant 0 : index
    %c0_26 = arith.constant 0 : index
    %80 = vector.load %arg6[%c0_25, %c0_26] : memref<1x128xf32, #tpu.memory_space<vmem>>, vector<1x128xf32>
    %81 = vector.broadcast %80 : vector<1x128xf32> to vector<128x128xf32>
    %82 = arith.mulf %79, %81 : vector<128x128xf32>
    %c0_27 = arith.constant 0 : index
    %c0_28 = arith.constant 0 : index
    %83 = vector.load %arg7[%c0_27, %c0_28] : memref<1x128xf32, #tpu.memory_space<vmem>>, vector<1x128xf32>
    %84 = vector.broadcast %83 : vector<1x128xf32> to vector<128x128xf32>
    %85 = arith.addf %82, %84 : vector<128x128xf32>
    %cst_29 = arith.constant 0.000000e+00 : f32
    %86 = vector.broadcast %cst_29 : f32 to vector<128x128xf32>
    %87 = arith.maximumf %85, %86 : vector<128x128xf32>
    %88 = arith.truncf %87 : vector<128x128xf32> to vector<128x128xbf16>
    %c0_30 = arith.constant 0 : index
    %c0_31 = arith.constant 0 : index
    %89 = vector.load %arg8[%c0_30, %c0_31] : memref<128x128xbf16, #tpu.memory_space<vmem>>, vector<128x128xbf16>
    %cst_32 = arith.constant dense<0.000000e+00> : vector<128x128xf32>
    %90 = tpu.matmul %88, %89, %cst_32 {dimension_numbers = #tpu.dot_dimension_numbers<[1], [0], [0], [1], [0, 0, 1, 1], [], []>} : vector<128x128xbf16>, vector<128x128xbf16>, vector<128x128xf32> -> vector<128x128xf32>
    %c0_33 = arith.constant 0 : index
    %c0_34 = arith.constant 0 : index
    %91 = vector.load %arg9[%c0_33, %c0_34] : memref<1x128xf32, #tpu.memory_space<vmem>>, vector<1x128xf32>
    %92 = vector.broadcast %91 : vector<1x128xf32> to vector<128x128xf32>
    %93 = arith.mulf %90, %92 : vector<128x128xf32>
    %c0_35 = arith.constant 0 : index
    %c0_36 = arith.constant 0 : index
    %94 = vector.load %arg10[%c0_35, %c0_36] : memref<1x128xf32, #tpu.memory_space<vmem>>, vector<1x128xf32>
    %95 = vector.broadcast %94 : vector<1x128xf32> to vector<128x128xf32>
    %96 = arith.addf %93, %95 : vector<128x128xf32>
    %c0_37 = arith.constant 0 : index
    %c0_38 = arith.constant 0 : index
    %c0_39 = arith.constant 0 : index
    %c0_40 = arith.constant 0 : index
    %97 = vector.load %arg1[%c0_37, %c0_38, %c0_39, %c0_40] : memref<1x8x16x128xbf16, #tpu.memory_space<vmem>>, vector<1x8x16x128xbf16>
    %98 = vector.shape_cast %97 : vector<1x8x16x128xbf16> to vector<128x128xbf16>
    %99 = arith.extf %98 : vector<128x128xbf16> to vector<128x128xf32>
    %100 = arith.addf %96, %99 : vector<128x128xf32>
    %cst_41 = arith.constant 0.000000e+00 : f32
    %101 = vector.broadcast %cst_41 : f32 to vector<128x128xf32>
    %102 = arith.maximumf %100, %101 : vector<128x128xf32>
    %103 = vector.shape_cast %102 : vector<128x128xf32> to vector<1x8x16x128xf32>
    %c0_42 = arith.constant 0 : index
    %c0_43 = arith.constant 0 : index
    %c0_44 = arith.constant 0 : index
    %c0_45 = arith.constant 0 : index
    %104 = vector.load %arg11[%c0_42, %c0_43, %c0_44, %c0_45] : memref<1x8x16x128xf32, #tpu.memory_space<vmem>>, vector<1x8x16x128xf32>
    tpu.vector_store %arg11[%c0_42, %c0_43, %c0_44, %c0_45], %103 {strides = array<i32>} : memref<1x8x16x128xf32, #tpu.memory_space<vmem>>, vector<1x8x16x128xf32>,
    return
  }
  func.func @transform_0(%arg0: i32) -> (i32, i32, i32, i32) {
    %c0_i32 = arith.constant 0 : i32
    %c0_i32_0 = arith.constant 0 : i32
    %c0_i32_1 = arith.constant 0 : i32
    %c0_i32_2 = arith.constant 0 : i32
    return %arg0, %c0_i32, %c0_i32_0, %c0_i32_1 : i32, i32, i32, i32
  }
  func.func @transform_1(%arg0: i32) -> (i32, i32) {
    %c0_i32 = arith.constant 0 : i32
    %c0_i32_0 = arith.constant 0 : i32
    %c0_i32_1 = arith.constant 0 : i32
    return %c0_i32, %c0_i32_0 : i32, i32
  }
  func.func @transform_2(%arg0: i32) -> (i32, i32) {
    %c0_i32 = arith.constant 0 : i32
    %c0_i32_0 = arith.constant 0 : i32
    %c0_i32_1 = arith.constant 0 : i32
    return %c0_i32, %c0_i32_0 : i32, i32
  }
  func.func @transform_3(%arg0: i32) -> (i32, i32) {
    %c0_i32 = arith.constant 0 : i32
    %c0_i32_0 = arith.constant 0 : i32
    %c0_i32_1 = arith.constant 0 : i32
    return %c0_i32, %c0_i32_0 : i32, i32
  }
  func.func @transform_4(%arg0: i32) -> (i32, i32, i32) {
    %c0_i32 = arith.constant 0 : i32
    %c0_i32_0 = arith.constant 0 : i32
    %c0_i32_1 = arith.constant 0 : i32
    %c0_i32_2 = arith.constant 0 : i32
    return %c0_i32, %c0_i32_0, %c0_i32_1 : i32, i32, i32
  }
  func.func @transform_5(%arg0: i32) -> (i32, i32) {
    %c0_i32 = arith.constant 0 : i32
    %c0_i32_0 = arith.constant 0 : i32
    %c0_i32_1 = arith.constant 0 : i32
    return %c0_i32, %c0_i32_0 : i32, i32
  }
  func.func @transform_6(%arg0: i32) -> (i32, i32) {
    %c0_i32 = arith.constant 0 : i32
    %c0_i32_0 = arith.constant 0 : i32
    %c0_i32_1 = arith.constant 0 : i32
    return %c0_i32, %c0_i32_0 : i32, i32
  }
  func.func @transform_7(%arg0: i32) -> (i32, i32) {
    %c0_i32 = arith.constant 0 : i32
    %c0_i32_0 = arith.constant 0 : i32
    %c0_i32_1 = arith.constant 0 : i32
    return %c0_i32, %c0_i32_0 : i32, i32
  }
  func.func @transform_8(%arg0: i32) -> (i32, i32) {
    %c0_i32 = arith.constant 0 : i32
    %c0_i32_0 = arith.constant 0 : i32
    %c0_i32_1 = arith.constant 0 : i32
    return %c0_i32, %c0_i32_0 : i32, i32
  }
  func.func @transform_9(%arg0: i32) -> (i32, i32) {
    %c0_i32 = arith.constant 0 : i32
    %c0_i32_0 = arith.constant 0 : i32
    %c0_i32_1 = arith.constant 0 : i32
    return %c0_i32, %c0_i32_0 : i32, i32
  }
  func.func @transform_10(%arg0: i32) -> (i32, i32, i32, i32) {
    %c0_i32 = arith.constant 0 : i32
    %c0_i32_0 = arith.constant 0 : i32
    %c0_i32_1 = arith.constant 0 : i32
    %c0_i32_2 = arith.constant 0 : i32
    return %arg0, %c0_i32, %c0_i32_0, %c0_i32_1 : i32, i32, i32, i32
  }
}

</mosaic_0001>

<bundles_post_ra>
// kernel: tpu_custom_call.1
= control target key start
LH: loop header
LB: loop body
LE: loop exit
PB: predicated region body
PF: predicated region fallthrough
CT: control target
= control target key end

     0   :  { %s4928_s0 = inlined_call_operand.hbm [shape: bf16[2,8,16,128], index: 0, kind: input, shape index: {}]   ;;  %s4929_s1 = inlined_call_operand.hbm [shape: bf16[128,128], index: 1, kind: input, shape index: {}]   ;;  %s4930_s2 = inlined_call_operand.vmem [shape: f32[1,128], index: 2, kind: input, shape index: {}]   ;;  %s4931_s3 = inlined_call_operand.vmem [shape: f32[1,128], index: 3, kind: input, shape index: {}]   ;;  %s4932_s4 = inlined_call_operand.hbm [shape: bf16[3,384,128], index: 4, kind: input, shape index: {}]   ;;  %s4933_s5 = inlined_call_operand.vmem [shape: f32[1,128], index: 5, kind: input, shape index: {}]   ;;  %s4934_s6 = inlined_call_operand.vmem [shape: f32[1,128], index: 6, kind: input, shape index: {}]   ;;  %s4935_s7 = inlined_call_operand.hbm [shape: bf16[128,128], index: 7, kind: input, shape index: {}]   ;;  %s4936_s8 = inlined_call_operand.vmem [shape: f32[1,128], index: 8, kind: input, shape index: {}]   ;;  %s4937_s9 = inlined_call_operand.vmem [shape: f32[1,128], index: 9, kind: input, shape index: {}]   ;;  %s4938_s10 = inlined_call_operand.hbm [shape: f32[2,8,16,128], index: 10, kind: output, shape index: {}]  }
   0x1   :  { %4965 = sst [smem:[#allocation33_spill]] %s4929_s1 }
   0x2   :  { %4966 = sst [smem:[#allocation34_spill]] %s4932_s4 }
   0x3   :  { %4967 = sst [smem:[#allocation35_spill]] %s4935_s7 }
   0x4   :  { %15 = vsyncpa [#allocation3], 0 }
   0x5   :  { %17 = vsyncpa [#allocation3 + $0x1], 0 }
   0x6   :  { %18 = vsyncpa [#allocation6], 0 }
   0x7   :  { %19 = vsyncpa [#allocation9], 0 }
   0x8   :  { %20 = vsyncpa [#allocation4], 0 }
   0x9   :  { %22 = vsyncpa [#allocation4 + $0x1], 0  ;;  %s3861_s13 = smov 0   ;;  %s3863_s14 = smov 0  }
   0xa   :  { %s3865_s15 = smov 0   ;;  %s3867_s16 = smov 0  }
   0xb LB: > { %s3882_s17 = sadd.s32 4294967295, %s3796_s16   ;;  %s2972_s18 = sadd.s32 4294967294, %s3796_s16   ;;  %s3796_s16 = sphi %s3867_s16, %s5063_s16   ;;  %s3792_s15 = sphi %s3865_s15, %s5062_s15   ;;  %s3788_s14 = sphi %s3863_s14, %s5061_s14   ;;  %s3784_s13 = sphi %s3861_s13, %s5060_s13  }
   0xc   : > { %p48_p0 = scmp.ne.s32.totalorder %s3788_s14, %s3784_s13  ;;  %p49_p1 = scmp.eq.s32.totalorder %s3882_s17, 0 }
   0xd   : > { %p261_p2 = scmp.eq.s32.totalorder %s3882_s17, 1  ;;  %p267_p3 = scmp.eq.s32.totalorder %s2972_s18, 1 }
   0xe   : > { %p3891_p4 = por %p49_p1, %p48_p0  ;;  %p2973_p5 = scmp.ge.s32.totalorder %s3796_s16, 1 }
   0xf   : > { %p3896_p6 = por %p267_p3, %p48_p0  ;;  %p274_p7 = scmp.lt.s32.totalorder %s3796_s16, 3 }
  0x10   : > { %s4970_s1 = sld [smem:[#allocation33_spill]]  ;;  %s3798_s25 = smov [#allocation5]  }
  0x11   : > { %p3904_p8 = pnand %p2973_p5, %p274_p7  ;;  %s287_s26 = sshll.u32 %s3798_s25, 4  ;;  %s288_s26 = int_to_ptr.vmem [resolvable:$true] %s287_s26 }
  0x12   : > { %s4973_s4 = sld [smem:[#allocation34_spill]]  ;;  %s4939_s11 = smov 64  }
  0x13   : > { %p3530_p9 = pneg %p3904_p8  ;;  %s4940_s12 = smov 4  }
  0x14   : > { %s3801_s18 = smov [#allocation7]   ;;  %s4974_s7 = sld [smem:[#allocation35_spill]] }
  0x15   : > { %p3912_p10 = pnand %p3530_p9, %p49_p1  ;;  %s307_s21 = sshll.u32 %s3801_s18, 4  ;;  %s308_s21 = int_to_ptr.vmem [resolvable:$true] %s307_s21 }
  0x16   : > { %s285_s23 = sshll.u32 %s4970_s1, 4  ;;  %s3934_s29 = sadd.s32 1, %s3796_s16   ;;  %s286_s23 = int_to_ptr.hbm [resolvable:$true] %s285_s23 }
  0x17   : > { %3533 = dma.hbm_to_vmem [thread:$0]  (!%p3912_p10), %s286_s23, 1024, %s288_s26, [#allocation6], %s4939_s11, %s4939_s11, %s4940_s12  }
  0x18   : > { %s305_s30 = sshll.u32 %s4973_s4, 4  ;;  %s3802_s23 = smov [#allocation8]   ;;  %s306_s30 = int_to_ptr.hbm [resolvable:$true] %s305_s30 }
  0x19   : > { %3536 = dma.hbm_to_vmem [thread:$0]  (!%p3912_p10), %s306_s30, 9216, %s308_s21, [#allocation6], %s4939_s11, %s4939_s11, %s4940_s12  }
  0x1a   : > { %s325_s28 = sshll.u32 %s4974_s7, 4  ;;  %s327_s26 = sshll.u32 %s3802_s23, 4  ;;  %s326_s28 = int_to_ptr.hbm [resolvable:$true] %s325_s28  ;;  %s328_s26 = int_to_ptr.vmem [resolvable:$true] %s327_s26 }
  0x1b   : > { %3539 = dma.hbm_to_vmem [thread:$0]  (!%p3912_p10), %s326_s28, 1024, %s328_s26, [#allocation9], %s4939_s11, %s4939_s11, %s4940_s12  }
  0x1c   : > { %s32_s18 = ssub.s32 %s3796_s16, %s3934_s29  ;;  %s35_s22 = sadd.s32 1, %s3792_s15 }
  0x1d   : > { %p33_p12 = scmp.eq.s32.totalorder %s32_s18, 0  ;;  %p42_p13 = scmp.ne.s32.totalorder %s3792_s15, %s3788_s14 }
  0x1e   : > { %p43_p0 = scmp.eq.s32.totalorder %s3796_s16, 0  ;;  %p3551_p5 = scmp.lt.s32.totalorder %s3796_s16, 2 }
  0x1f   : > { %s3948_s25 = scalar_select %p33_p12, %s3792_s15, %s35_s22  }
  0x20   : > { %p3952_p3 = por %p261_p2, %p42_p13  ;;  %s347_s21 = sand.u32 1, %s3792_s15  }
  0x21   : > { %4975 = sst [smem:[#allocation15_spill]] %s3948_s25  ;;  %s3392_s27 = sshll.u32 %s3796_s16, 6 }
  0x22   : > { %p44_p7 = por %p43_p0, %p42_p13  ;;  %s2978_s23 = sshll.u32 %s347_s21, 6 }
  0x23   : > { %s356_s28 = scalar_lea.hbm %s4928_s0, %s3392_s27  ;;  %s351_s18 = scalar_lea.vmem [#allocation2], %s2978_s23 }
  0x24   : > { %s357_s26 = sshll.u32 %s356_s28, 4  ;;  %s359_s11 = sshll.u32 %s351_s18, 4  ;;  %s358_s26 = int_to_ptr.hbm [resolvable:$true] %s357_s26  ;;  %s360_s11 = int_to_ptr.vmem [resolvable:$true] %s359_s11 }
  0x25   : > { %p3962_p9 = pnand %p3551_p5, %p44_p7  ;;  %s348_s12 = scalar_lea.sflag [#allocation3], %s347_s21 }
  0x26   : > { %s3692_s7 = sshra.s32 %s358_s26, 4  ;;  %s3699_s27 = scalar_lea.hbm %s4928_s0, 128  ;;  %s3693_s7 = int_to_ptr.hbm [resolvable:$true] %s3692_s7 }
  0x27   : > { %s3694_s25 = scalar_lea.hbm %s3693_s7, 64  ;;  %p3696_p10 = pneg %p3962_p9 }
  0x28   : > { %p3695_p2 = scmp.ne.s32.totalorder %s3693_s7, %s3694_s25  ;;  %p3700_p0 = scmp.lt.s32.totalorder %s3693_s7, %s4928_s0 }
  0x29   : > { %p3701_p5 = scmp.lt.s32.totalorder %s3699_s27, %s3694_s25 }
  0x2a   : > { %p3697_p12 = pnand %p3696_p10, %p3695_p2 }
  0x2b   : > { %p3702_p7 = por %p3701_p5, %p3700_p0 }
  0x2c   : > { %p3698_p13 = pneg %p3697_p12 }
  0x2e   : > { %p3703_p11 = pnand %p3702_p7, %p3698_p13 }
  0x30   : > { %3706 = shalt.err (!%p3703_p11)
}
  0x31   : > { %s4978_s21 = smov 4   ;;  %s4979_s18 = smov 64  }
  0x32   : > { %3543 = dma.hbm_to_vmem [thread:$0]  (!%p3962_p9), %s358_s26, 1024, %s360_s11, %s348_s12, %s4979_s18, %s4979_s18, %s4978_s21  }
  0x33   : > { %371 = sbr.rel (%p3904_p8) target bundleno = 933 (0x3a5), region = 60 }
  0x38   : > { %s3982_s1 = sand.u32 1, %s3788_s14  }
  0x39   : > { %s2982_s7 = sshll.u32 %s3982_s1, 6  ;;  %s374_s25 = scalar_lea.sflag [#allocation3], %s3982_s1 }
  0x3a   : > { %s3986_s4 = scalar_lea.vmem [#allocation2], %s2982_s7 }
  0x3b   : > { %3767 = dma.done.wait (%p3891_p4), %s374_s25, 1024  }
  0x3c   : > { %3769 = vsyncadd (%p3891_p4), %s374_s25, 4294966272 }
  0x3d   : > { %3771 = dma.done.wait (%p49_p1), [#allocation6], 10240  }
  0x3e   : > { %3773 = vsyncadd (%p49_p1), [#allocation6], 4294957056 }
  0x3f   : > { %3775 = dma.done.wait (%p49_p1), [#allocation9], 1024  }
  0x40   : > { %3777 = vsyncadd (%p49_p1), [#allocation9], 4294966272  ;;  %v3408_v0 = vld [vmem:[#allocation5 + $0x38] sm:$0xff]  ;;  %v3407_v1 = vld [vmem:[#allocation5 + $0x30] sm:$0xff]  ;;  %v663_v36 = vlaneseq  ;;  %v4944_v47 = vmov 0.0   ;;  %s2986_s25 = sshll.u32 %s3982_s1, 7 }
  0x41   : > { %558 = vmatpush.bf16.msra.mxu0 %v3408_v0  ;;  %3490 = vmatpush.bf16.msra.mxu3 %v3408_v0  ;;  %v3406_v2 = vld [vmem:[#allocation5 + $0x28] sm:$0xff]  ;;  %v3405_v3 = vld [vmem:[#allocation5 + $0x20] sm:$0xff]  ;;  %v3404_v4 = vld [vmem:[#allocation5 + $0x18] sm:$0xff]  ;;  %s4839_s19 = scalar_lea.vmem [#allocation10], %s2986_s25  ;;  %s3489_s24 = sshll.u32 %s3882_s17, 7 }
  0x42   : > { %v3403_v5 = vld [vmem:[#allocation5 + $0x10] sm:$0xff]  ;;  %v3402_v6 = vld [vmem:[#allocation5 + $0x8] sm:$0xff]  ;;  %v3401_v7 = vld [vmem:[#allocation5] sm:$0xff]  ;;  %v4032_v39 = vshrl.u32 %v663_v36, 7  ;;  %s2866_s26 = scalar_lea.hbm %s4938_s10, %s3489_s24  ;;  %s2855_s17 = scalar_lea.sflag [#allocation4], %s3982_s1 }
  0x43   : > { %v3393_v8 = vld [vmem:[%s3986_s4] sm:$0xff]  ;;  %v3395_v9 = vld [vmem:[%s3986_s4 + $0x10] sm:$0xff]  ;;  %v3394_v10 = vld [vmem:[%s3986_s4 + $0x8] sm:$0xff]  ;;  %s2869_s22 = sshll.u32 %s2866_s26, 4  ;;  %s3742_s18 = scalar_lea.hbm %s4938_s10, 256  ;;  %s2870_s22 = int_to_ptr.hbm [resolvable:$true] %s2869_s22 }
  0x44   : > { %v3396_v11 = vld [vmem:[%s3986_s4 + $0x18] sm:$0xff]  ;;  %v3397_v12 = vld [vmem:[%s3986_s4 + $0x20] sm:$0xff]  ;;  %v3398_v13 = vld [vmem:[%s3986_s4 + $0x28] sm:$0xff]  ;;  %v666_v41 = vadd.s32 16, %v4032_v39  ;;  %v668_v46 = vadd.s32 32, %v4032_v39  ;;  %v684_v53 = vand.u32 15, %v4032_v39 }
  0x45   : > { %559 = vmatpush.bf16.msra.mxu0 %v3407_v1  ;;  %3491 = vmatpush.bf16.msra.mxu3 %v3407_v1  ;;  %v4006_v14 = vld [vmem:[#allocation7 + $0x138] sm:$0xff]  ;;  %v4009_v16 = vld [vmem:[#allocation7 + $0x130] sm:$0xff]  ;;  %v4014_v19 = vld [vmem:[#allocation7 + $0x128] sm:$0xff]  ;;  %v670_v55 = vadd.s32 48, %v4032_v39  ;;  %vm1305_vm4 = vcmp.lt.s32.totalorder %v4032_v39, 7  ;;  %vm1224_vm5 = vcmp.lt.s32.totalorder %v4032_v39, 1 }
  0x46   : > { %v3456_v15 = vld [vmem:[#allocation7 + $0x178] sm:$0xff]  ;;  %3506 = vmatpush.bf16.msra.mxu2 %v4006_v14  ;;  %v3399_v17 = vld [vmem:[%s3986_s4 + $0x30] sm:$0xff]  ;;  %v4017_v21 = vld [vmem:[#allocation7 + $0x120] sm:$0xff]  ;;  %v698_v44 = vand.u32 15, %v666_v41  ;;  %v712_v54 = vand.u32 15, %v668_v46  ;;  %vm1160_vm1 = vcmp.le.s32.totalorder %v684_v53, 6 }
  0x47   : > { %v3400_v18 = vld [vmem:[%s3986_s4 + $0x38] sm:$0xff]  ;;  %v3455_v20 = vld [vmem:[#allocation7 + $0x170] sm:$0xff]  ;;  %v3454_v23 = vld [vmem:[#allocation7 + $0x168] sm:$0xff]  ;;  %v726_v60 = vand.u32 15, %v670_v55  ;;  %v4067_v1 = vadd.s32 112, %v4032_v39  ;;  %vm1112_vm9 = vcmp.ge.s32.totalorder %v684_v53, 1 }
  0x48   : > { %v3440_v22 = vld [vmem:[#allocation7 + $0xf8] sm:$0xff]  ;;  %v3439_v25 = vld [vmem:[#allocation7 + $0xf0] sm:$0xff]  ;;  %v3453_v26 = vld [vmem:[#allocation7 + $0x160] sm:$0xff]  ;;  %vm1114_vm0 = vcmp.ge.s32.totalorder %v698_v44, 1  ;;  %vm1162_vm2 = vcmp.le.s32.totalorder %v698_v44, 6  ;;  %vm1164_vm3 = vcmp.le.s32.totalorder %v712_v54, 6 }
  0x49   : > { %560 = vmatpush.bf16.msra.mxu0 %v3406_v2  ;;  %3492 = vmatpush.bf16.msra.mxu3 %v3406_v2  ;;  %v4020_v24 = vld [vmem:[#allocation7 + $0x118] sm:$0xff]  ;;  %v4023_v27 = vld [vmem:[#allocation7 + $0x110] sm:$0xff]  ;;  %v3438_v28 = vld [vmem:[#allocation7 + $0xe8] sm:$0xff]  ;;  %v4042_v48 = vsel %vm1114_vm0, 1.0, %v4944_v47  ;;  %vm4079_vm6 = vcmp.ge.s32.totalorder %v712_v54, 1  ;;  %vm4084_vm7 = vcmp.le.s32.totalorder %v726_v60, 6 }
  0x4a   : > { %3507 = vmatpush.bf16.msra.mxu2 %v4009_v16  ;;  %3498 = vmatpush.bf16.msra.mxu1 %v3440_v22  ;;  %v3452_v29 = vld [vmem:[#allocation7 + $0x158] sm:$0xff]  ;;  %v4026_v30 = vld [vmem:[#allocation7 + $0x108] sm:$0xff]  ;;  %v3437_v31 = vld [vmem:[#allocation7 + $0xe0] sm:$0xff]  ;;  %vm4096_vm8 = vcmp.ge.s32.totalorder %v726_v60, 1  ;;  %v3053_v41 = vsel %vm4079_vm6, 1.0, %v4944_v47  ;;  %s3736_s27 = sshra.s32 %s2870_s22, 4  ;;  %s3737_s27 = int_to_ptr.hbm [resolvable:$true] %s3736_s27 }
  0x4b   : > { %v3451_v32 = vld [vmem:[#allocation7 + $0x150] sm:$0xff]  ;;  %v4029_v33 = vld [vmem:[#allocation7 + $0x100] sm:$0xff]  ;;  %v3436_v34 = vld [vmem:[#allocation7 + $0xd8] sm:$0xff]  ;;  %v4159_v44 = vsel %vm4096_vm8, 1.0, %v4944_v47  ;;  %s3738_s23 = scalar_lea.hbm %s3737_s27, 128  ;;  %p3743_p11 = scmp.lt.s32.totalorder %s3737_s27, %s4938_s10 }
  0x4c   : > { %v3450_v35 = vld [vmem:[#allocation7 + $0x148] sm:$0xff]  ;;  %v3435_v37 = vld [vmem:[#allocation7 + $0xd0] sm:$0xff]  ;;  %v3449_v38 = vld [vmem:[#allocation7 + $0x140] sm:$0xff]  ;;  %p3739_p1 = scmp.ne.s32.totalorder %s3737_s27, %s3738_s23  ;;  %p3744_p9 = scmp.lt.s32.totalorder %s3742_s18, %s3738_s23 }
  0x4d   : > { %561 = vmatpush.bf16.msra.mxu0 %v3405_v3  ;;  %3493 = vmatpush.bf16.msra.mxu3 %v3405_v3  ;;  %v3434_v40 = vld [vmem:[#allocation7 + $0xc8] sm:$0xff]  ;;  %v3433_v43 = vld [vmem:[#allocation7 + $0xc0] sm:$0xff]  ;;  %v4071_v3 = vsel %vm1160_vm1, 1.0, %v4944_v47 }
  0x4e   : > { %3508 = vmatpush.bf16.msra.mxu2 %v4014_v19  ;;  %3499 = vmatpush.bf16.msra.mxu1 %v3439_v25  ;;  %v4038_v45 = vld [vmem:[%s4930_s2] ss:$0 sm:$0xff]  ;;  %p3740_p4 = pnand %p3739_p1, %p3952_p3  ;;  %p3745_p2 = por %p3744_p9, %p3743_p11 }
  0x4f   : > { %v4049_v51 = vld [vmem:[%s4931_s3] ss:$0 sm:$0xff] }
  0x50   : > { %p3741_p8 = pneg %p3740_p4 }
  0x51   : > { %562 = vmatpush.bf16.msra.mxu0 %v3404_v4  ;;  %3494 = vmatpush.bf16.msra.mxu3 %v3404_v4  ;;  %v4074_v4 = vsel %vm1162_vm2, 1.0, %v4944_v47 }
  0x52   : > { %3509 = vmatpush.bf16.msra.mxu2 %v4017_v21  ;;  %3500 = vmatpush.bf16.msra.mxu1 %v3438_v28  ;;  %p3746_p10 = pnand %p3745_p2, %p3741_p8 }
  0x55   : > { %563 = vmatpush.bf16.msra.mxu0 %v3403_v5  ;;  %3495 = vmatpush.bf16.msra.mxu3 %v3403_v5  ;;  %v4077_v5 = vsel %vm1164_vm3, 1.0, %v4944_v47 }
  0x56   : > { %3510 = vmatpush.bf16.msra.mxu2 %v4020_v24  ;;  %3501 = vmatpush.bf16.msra.mxu1 %v3437_v31 }
  0x59   : > { %564 = vmatpush.bf16.msra.mxu0 %v3402_v6  ;;  %3496 = vmatpush.bf16.msra.mxu3 %v3402_v6 }
  0x5a   : > { %3511 = vmatpush.bf16.msra.mxu2 %v4023_v27  ;;  %3502 = vmatpush.bf16.msra.mxu1 %v3436_v34 }
  0x5d   : > { %565 = vmatpush.bf16.msra.mxu0 %v3401_v7  ;;  %3497 = vmatpush.bf16.msra.mxu3 %v3401_v7 }
  0x5e   : > { %3512 = vmatpush.bf16.msra.mxu2 %v4026_v30  ;;  %3503 = vmatpush.bf16.msra.mxu1 %v3435_v37 }
  0x60   : > { %566 = vmatmul.bf16.vlgmr.msra.gmra.mxu0 %v3393_v8  ;;  %576 = vmatmul.bf16.vlgmr.msra.gmra.mxu3 %v3395_v9  ;;  %v672_v8 = vadd.s32 64, %v4032_v39 }
  0x61   : > { %1773 = vmatpush.bf16.msrb.mxu3 %v3456_v15  ;;  %1675 = vmatpush.bf16.msrb.mxu0 %v3440_v22 }
  0x62   : > { %3513 = vmatpush.bf16.msra.mxu2 %v4029_v33  ;;  %3504 = vmatpush.bf16.msra.mxu1 %v3434_v40 }
  0x65   : > { %1774 = vmatpush.bf16.msrb.mxu3 %v3455_v20  ;;  %1676 = vmatpush.bf16.msrb.mxu0 %v3439_v25 }
  0x66   : > { %3505 = vmatpush.bf16.msra.mxu1 %v3433_v43 }
  0x69   : > { %1775 = vmatpush.bf16.msrb.mxu3 %v3454_v23  ;;  %1677 = vmatpush.bf16.msrb.mxu0 %v3438_v28  ;;  %v4110_v23 = vsel %vm1112_vm9, 1.0, %v4944_v47 }
  0x6d   : > { %1776 = vmatpush.bf16.msrb.mxu3 %v3453_v26  ;;  %1678 = vmatpush.bf16.msrb.mxu0 %v3437_v31 }
  0x70   : > { %571 = vmatmul.bf16.gmra.mxu0 %v3394_v10  ;;  %581 = vmatmul.bf16.gmra.mxu3 %v3396_v11  ;;  %v4943_v10 = vand.u32 15, %v4067_v1 }
  0x71   : > { %1777 = vmatpush.bf16.msrb.mxu3 %v3452_v29  ;;  %1679 = vmatpush.bf16.msrb.mxu0 %v3436_v34 }
  0x72   : > { %vm1174_vm10 = vcmp.le.s32.totalorder %v4943_v10, 6 }
  0x75   : > { %1778 = vmatpush.bf16.msrb.mxu3 %v3451_v32  ;;  %1680 = vmatpush.bf16.msrb.mxu0 %v3435_v37  ;;  %v4145_v37 = vsel %vm1174_vm10, 1.0, %v4944_v47 }
  0x79   : > { %1779 = vmatpush.bf16.msrb.mxu3 %v3450_v35  ;;  %1681 = vmatpush.bf16.msrb.mxu0 %v3434_v40  ;;  %v4138_v35 = vsel %vm4084_vm7, 1.0, %v4944_v47 }
  0x7d   : > { %1780 = vmatpush.bf16.msrb.mxu3 %v3449_v38  ;;  %1682 = vmatpush.bf16.msrb.mxu0 %v3433_v43 }
  0x80   : > { %586 = vmatmul.bf16.gmra.mxu3 %v3397_v12 }
  0x81   : > { %1724 = vmatpush.bf16.msra.mxu0 %v4006_v14 }
  0x85   : > { %1725 = vmatpush.bf16.msra.mxu0 %v4009_v16 }
  0x89   : > { %1726 = vmatpush.bf16.msra.mxu0 %v4014_v19 }
  0x8d   : > { %1727 = vmatpush.bf16.msra.mxu0 %v4017_v21  ;;  %v740_v21 = vand.u32 15, %v672_v8 }
  0x8f   : > { %vm4165_vm11 = vcmp.ge.s32.totalorder %v740_v21, 1  ;;  %vm4173_vm12 = vcmp.le.s32.totalorder %v740_v21, 6 }
  0x90   : > { %591 = vmatmul.bf16.gmra.mxu3 %v3398_v13 }
  0x91   : > { %1728 = vmatpush.bf16.msra.mxu0 %v4020_v24 }
  0x95   : > { %1729 = vmatpush.bf16.msra.mxu0 %v4023_v27 }
  0x99   : > { %1730 = vmatpush.bf16.msra.mxu0 %v4026_v30 }
  0x9d   : > { %1731 = vmatpush.bf16.msra.mxu0 %v4029_v33 }
  0xa0   : > { %596 = vmatmul.bf16.gmra.mxu3 %v3399_v17 }
  0xb0   : > { %601 = vmatmul.bf16.gmra.mxu3 %v3400_v18 }
  0xdd   : > { %v567_v42 = vpop.f32.mrf.mxu0 }
  0xde   : > { %v611_v49 = vmul.f32 %v4038_v45, %v567_v42 }
  0xe0   : > { %v631_v56 = vadd.f32 %v4049_v51, %v611_v49 }
  0xe2   : > { %v4058_v61 = vmax.f32 %v631_v56, 0.0  ;;  %v4181_v56 = vadd.s32 80, %v4032_v39 }
  0xe3   : > { %v577_v50 = vpop.f32.mrf.mxu3 }
  0xe4   : > { %v615_v58 = vmul.f32 %v4038_v45, %v577_v50  ;;  %v4941_v11 = vrot.slane %v4058_v61, 1  ;;  %v4942_v17 = vrot.slane %v4058_v61, 7 }
  0xe5   : > { %v569_v52 = vpop.f32.mrf.mxu0 }
  0xe6   : > { %v612_v57 = vmul.f32 %v4038_v45, %v569_v52  ;;  %v635_v63 = vadd.f32 %v4049_v51, %v615_v58 }
  0xe8   : > { %v632_v59 = vadd.f32 %v4049_v51, %v612_v57  ;;  %v4094_v15 = vmax.f32 %v635_v63, 0.0 }
  0xea   : > { %v4060_v62 = vmax.f32 %v632_v59, 0.0  ;;  %v1293_v32 = vrot.slane %v4094_v15, 1 }
  0xeb   : > { %v579_v0 = vpop.f32.mrf.mxu3 }
  0xec   : > { %v616_v2 = vmul.f32 %v4038_v45, %v579_v0  ;;  %v1290_v12 = vrot.slane %v4060_v62, 1  ;;  %v1209_v18 = vrot.slane %v4060_v62, 7  ;;  %v4107_v22 = vpack.c.bf16 %v4060_v62, %v4058_v61 }
  0xed   : > { %v572_v6 = vpop.f32.mrf.mxu0 }
  0xee   : > { %v636_v13 = vadd.f32 %v4049_v51, %v616_v2  ;;  %v613_v14 = vmul.f32 %v4038_v45, %v572_v6  ;;  %v4116_v25 = vsel %vm1224_vm5, %v4942_v17, %v1209_v18  ;;  %v4131_v31 = vsel %vm1305_vm4, %v4941_v11, %v1290_v12 }
  0xef   : > { %v4142_v36 = vmul.f32 %v4074_v4, %v4131_v31  ;;  %v1442_v43 = vmul.f32 %v4071_v3, %v4131_v31 }
  0xf0   : > { %v4102_v19 = vmax.f32 %v636_v13, 0.0  ;;  %v633_v20 = vadd.f32 %v4049_v51, %v613_v14  ;;  %v676_v13 = vadd.s32 96, %v4032_v39  ;;  %v1212_v14 = vrot.slane %v4094_v15, 7 }
  0xf2   : > { %v1294_v26 = vrot.slane %v4102_v19, 1  ;;  %v4121_v28 = vmax.f32 %v633_v20, 0.0  ;;  %v4125_v29 = vpack.c.bf16 %v4102_v19, %v4094_v15  ;;  %v1213_v63 = vrot.slane %v4102_v19, 7 }
  0xf3   : > { %v582_v34 = vpop.f32.mrf.mxu3  ;;  %v4213_v19 = vsel %vm4173_vm12, 1.0, %v4944_v47 }
  0xf4   : > { %v1210_v38 = vrot.slane %v4121_v28, 7  ;;  %v1291_v40 = vrot.slane %v4121_v28, 1  ;;  %v617_v24 = vmul.f32 %v4038_v45, %v582_v34  ;;  %1742 = vmatmul.bf16.vlgmr.msra.gmra.mxu2 %v4125_v29  ;;  %v4163_v46 = vsel %vm1305_vm4, %v1293_v32, %v1294_v26 }
  0xf5   : > { %v574_v42 = vpop.f32.mrf.mxu0  ;;  %v4187_v58 = vmul.f32 %v4138_v35, %v4163_v46  ;;  %v4217_v20 = vmul.f32 %v4074_v4, %v4163_v46 }
  0xf6   : > { %v637_v50 = vadd.f32 %v4049_v51, %v617_v24  ;;  %v614_v52 = vmul.f32 %v4038_v45, %v574_v42  ;;  %v1319_v53 = vsel %vm1305_vm4, %v1290_v12, %v1291_v40  ;;  %v1238_v57 = vsel %vm1224_vm5, %v1209_v18, %v1210_v38 }
  0xf7   : > { %v4178_v55 = vmul.f32 0.0, %v1319_v53  ;;  %v4192_v0 = vmul.f32 %v4042_v48, %v1238_v57  ;;  %v4196_v2 = vmul.f32 %v4110_v23, %v1238_v57  ;;  %v4200_v7 = vmul.f32 %v3053_v41, %v1238_v57  ;;  %4990 = vst [vmem:[#allocation16_spill] sm:$0xff] %v4217_v20  ;;  %v3431_v20 = vld [vmem:[#allocation7 + $0xb0] sm:$0xff] }
  0xf8   : > { %v653_v59 = vmax.f32 %v637_v50, 0.0  ;;  %v634_v60 = vadd.f32 %v4049_v51, %v614_v52  ;;  %v4208_v18 = vsel %vm4165_vm11, 1.0, %v4944_v47  ;;  %v754_v42 = vand.u32 15, %v4181_v56 }
  0xf9   : > { %v1460_v27 = vpack.c.bf16 %v4178_v55, %v1442_v43  ;;  %v768_v43 = vand.u32 15, %v676_v13 }
  0xfa   : > { %v1214_v8 = vrot.slane %v653_v59, 7  ;;  %v1295_v9 = vrot.slane %v653_v59, 1  ;;  %v650_v12 = vmax.f32 %v634_v60, 0.0  ;;  %vm4258_vm14 = vcmp.ge.s32.totalorder %v754_v42, 1 }
  0xfb   : > { %v584_v16 = vpop.f32.mrf.mxu3  ;;  %1781 = vmatmul.bf16.vlgmr.msrb.gmra.mxu3 %v1460_v27  ;;  %vm1124_vm13 = vcmp.ge.s32.totalorder %v768_v43, 1  ;;  %vm1172_vm15 = vcmp.le.s32.totalorder %v768_v43, 6  ;;  %vm1170_vm0 = vcmp.le.s32.totalorder %v754_v42, 6 }
  0xfc   : > { %v1211_v21 = vrot.slane %v650_v12, 7  ;;  %v1292_v30 = vrot.slane %v650_v12, 1  ;;  %v618_v15 = vmul.f32 %v4038_v45, %v584_v16  ;;  %v4222_v34 = vsel %vm1224_vm5, %v1213_v63, %v1214_v8 }
  0xfd   : > { %v1315_v24 = vsel %vm1305_vm4, %v1294_v26, %v1295_v9  ;;  %v4228_v49 = vmul.f32 %v3053_v41, %v4222_v34  ;;  %v4240_v26 = vsel %vm1224_vm5, %v1212_v14, %v1213_v63  ;;  %v4263_v63 = vsel %vm1124_vm13, 1.0, %v4944_v47 }
  0xfe   : > { %v638_v50 = vadd.f32 %v4049_v51, %v618_v15  ;;  %v1236_v52 = vsel %vm1224_vm5, %v1211_v21, %v1212_v14  ;;  %v1317_v53 = vsel %vm1305_vm4, %v1292_v30, %v1293_v32  ;;  %v1318_v54 = vsel %vm1305_vm4, %v1291_v40, %v1292_v30 }
  0xff   : > { %v1430_v57 = vmul.f32 %v3053_v41, %v1236_v52  ;;  %v4242_v60 = vmul.f32 0.0, %v1317_v53  ;;  %v4245_v27 = vmul.f32 %v4071_v3, %v1318_v54  ;;  %v4247_v16 = vmul.f32 0.0, %v1315_v24 }
 0x100   : > { %v654_v13 = vmax.f32 %v638_v50, 0.0  ;;  %v4251_v32 = vsel %vm1224_vm5, %v1210_v38, %v1211_v21  ;;  %v2175_v38 = vmul.f32 0.0, %v4145_v37  ;;  %v4273_v53 = vmul.f32 %v4077_v5, %v1318_v54 }
 0x101   : > { %4991 = vst [vmem:[#allocation17_spill] sm:$0xff] %v4245_v27  ;;  %v1464_v33 = vpack.c.bf16 %v4240_v26, %v1430_v57  ;;  %v4276_v57 = vpack.c.bf16 %v650_v12, %v4121_v28  ;;  %v1444_v50 = vmul.f32 %v4074_v4, %v1318_v54  ;;  %v4294_v12 = vmul.f32 %v4042_v48, %v1236_v52 }
 0x102   : > { %v1296_v14 = vrot.slane %v654_v13, 1  ;;  %v4265_v30 = vpack.c.bf16 %v654_v13, %v653_v59  ;;  %v1215_v15 = vrot.slane %v654_v13, 7  ;;  %v4307_v4 = vsel %vm1172_vm15, 1.0, %v4944_v47 }
 0x103   : > { %v587_v21 = vpop.f32.mrf.mxu3  ;;  %1693 = vmatmul.bf16.vlgmr.msra.gmra.mxu1 %v1464_v33  ;;  %v4314_v6 = vmul.f32 %v4159_v44, %v1236_v52  ;;  %v1463_v54 = vpack.c.bf16 %v4242_v60, %v1444_v50  ;;  %v4330_v52 = vmul.f32 %v2175_v38, %v4131_v31  ;;  %v4338_v40 = vsel %vm4258_vm14, 1.0, %v4944_v47 }
 0x104   : > { %v619_v59 = vmul.f32 %v4038_v45, %v587_v21  ;;  %1747 = vmatmul.bf16.gmra.mxu2 %v4265_v30  ;;  %v4282_v13 = vsel %vm1224_vm5, %v1214_v8, %v1215_v15  ;;  %v4286_v33 = vsel %vm1305_vm4, %v1295_v9, %v1296_v14  ;;  %v4297_v21 = vmul.f32 0.0, %v4058_v61 }
 0x105   : > { %v4302_v9 = vmul.f32 %v4213_v19, %v4286_v33  ;;  %4995 = vst [vmem:[#allocation19_spill] sm:$0xff] %v4314_v6  ;;  %v4324_v24 = vmul.f32 %v4077_v5, %v4286_v33  ;;  %v3429_v6 = vld [vmem:[#allocation7 + $0xa0] sm:$0xff] }
 0x106   : > { %4994 = vst [vmem:[#allocation18_spill] sm:$0xff] %v4297_v21  ;;  %v639_v8 = vadd.f32 %v4049_v51, %v619_v59  ;;  %v4318_v59 = vmul.f32 %v4208_v18, %v4222_v34 }
 0x107   : > { %4997 = vst [vmem:[#allocation21_spill] sm:$0xff] %v4324_v24 }
 0x108   : > { %v655_v43 = vmax.f32 %v639_v8, 0.0  ;;  %4996 = vst [vmem:[#allocation20_spill] sm:$0xff] %v4318_v59  ;;  %v4333_v8 = vmul.f32 0.0, %v4060_v62 }
 0x109   : > { %4998 = vst [vmem:[#allocation22_spill] sm:$0xff] %v4330_v52 }
 0x10a   : > { %4999 = vst [vmem:[#allocation23_spill] sm:$0xff] %v4333_v8  ;;  %v1216_v11 = vrot.slane %v655_v43, 7  ;;  %v1297_v17 = vrot.slane %v655_v43, 1 }
 0x10b   : > { %v589_v50 = vpop.f32.mrf.mxu3  ;;  %1786 = vmatmul.bf16.gmra.mxu3 %v1463_v54 }
 0x10c   : > { %v620_v62 = vmul.f32 %v4038_v45, %v589_v50  ;;  %v1232_v38 = vsel %vm1224_vm5, %v1215_v15, %v1216_v11  ;;  %v1313_v41 = vsel %vm1305_vm4, %v1296_v14, %v1297_v17  ;;  %v5002_v50 = vand.u32 15, %v4067_v1 }
 0x10d   : > { %v4351_v47 = vmul.f32 0.0, %v1313_v41  ;;  %v4354_v10 = vmul.f32 %v4159_v44, %v1232_v38  ;;  %v4357_v54 = vmul.f32 %v4338_v40, %v1232_v38  ;;  %v1432_v15 = vmul.f32 %v4159_v44, %v4222_v34 }
 0x10e   : > { %v640_v28 = vadd.f32 %v4049_v51, %v620_v62  ;;  %vm1126_vm1 = vcmp.ge.s32.totalorder %v5002_v50, 1  ;;  %v5003_v14 = vmov 0.0   ;;  %v3424_v50 = vld [vmem:[#allocation7 + $0x78] sm:$0xff] }
 0x10f   : > { %5000 = vst [vmem:[#allocation24_spill] sm:$0xff] %v4354_v10  ;;  %v4367_v41 = vsel %vm1126_vm1, 1.0, %v5003_v14  ;;  %v1467_v62 = vpack.c.bf16 %v4282_v13, %v1432_v15  ;;  %v4377_v52 = vsel %vm1170_vm0, 1.0, %v5003_v14  ;;  %2015 = vmatpush.bf16.msrb.mxu1 %v3424_v50  ;;  %v3432_v14 = vld [vmem:[#allocation7 + $0xb8] sm:$0xff] }
 0x110   : > { %5001 = vst [vmem:[#allocation25_spill] sm:$0xff] %v4357_v54  ;;  %v656_v8 = vmax.f32 %v640_v28, 0.0  ;;  %2064 = vmatpush.bf16.msrb.mxu2 %v3432_v14 }
 0x112   : > { %v1298_v56 = vrot.slane %v656_v8, 1  ;;  %v4374_v42 = vpack.c.bf16 %v656_v8, %v655_v43  ;;  %v1217_v1 = vrot.slane %v656_v8, 7  ;;  %v3423_v8 = vld [vmem:[#allocation7 + $0x70] sm:$0xff] }
 0x113   : > { %v592_v44 = vpop.f32.mrf.mxu3  ;;  %1698 = vmatmul.bf16.gmra.mxu1 %v1467_v62 }
 0x114   : > { %5004 = vst [vmem:[#allocation26_spill] sm:$0xff] %v4374_v42  ;;  %v621_v34 = vmul.f32 %v4038_v45, %v592_v44  ;;  %1752 = vmatmul.bf16.gmra.mxu2 %v4374_v42  ;;  %v4383_v21 = vsel %vm1224_vm5, %v1216_v11, %v1217_v1  ;;  %v4387_v28 = vsel %vm1305_vm4, %v1297_v17, %v1298_v56 }
 0x115   : > { %v4391_v43 = vmul.f32 %v4377_v52, %v4387_v28  ;;  %v4400_v11 = vmul.f32 %v4138_v35, %v4387_v28  ;;  %v1446_v17 = vmul.f32 %v4077_v5, %v4163_v46  ;;  %2016 = vmatpush.bf16.msrb.mxu1 %v3423_v8  ;;  %2065 = vmatpush.bf16.msrb.mxu2 %v3431_v20 }
 0x116   : > { %v641_v15 = vadd.f32 %v4049_v51, %v621_v34 }
 0x117   : > { %5005 = vst [vmem:[#allocation27_spill] sm:$0xff] %v4400_v11  ;;  %v1466_v44 = vpack.c.bf16 %v4247_v16, %v1446_v17 }
 0x118   : > { %v657_v50 = vmax.f32 %v641_v15, 0.0 }
 0x11a   : > { %v1218_v31 = vrot.slane %v657_v50, 7  ;;  %v1299_v24 = vrot.slane %v657_v50, 1 }
 0x11b   : > { %v594_v34 = vpop.f32.mrf.mxu3  ;;  %1791 = vmatmul.bf16.gmra.mxu3 %v1466_v44  ;;  %v3430_v44 = vld [vmem:[#allocation7 + $0xa8] sm:$0xff] }
 0x11c   : > { %v622_v27 = vmul.f32 %v4038_v45, %v594_v34  ;;  %v1230_v62 = vsel %vm1224_vm5, %v1217_v1, %v1218_v31  ;;  %v1311_v5 = vsel %vm1305_vm4, %v1298_v56, %v1299_v24  ;;  %v1434_v34 = vmul.f32 %v4208_v18, %v1232_v38  ;;  %2066 = vmatpush.bf16.msrb.mxu2 %v3430_v44 }
 0x11d   : > { %v4410_v46 = vmul.f32 0.0, %v1311_v5  ;;  %v4413_v15 = vmul.f32 %v4208_v18, %v1230_v62  ;;  %v4416_v14 = vmul.f32 %v4263_v63, %v1230_v62 }
 0x11e   : > { %v642_v17 = vadd.f32 %v4049_v51, %v622_v27  ;;  %v1470_v8 = vpack.c.bf16 %v4383_v21, %v1434_v34  ;;  %v3422_v27 = vld [vmem:[#allocation7 + $0x68] sm:$0xff] }
 0x11f   : > { %5006 = vst [vmem:[#allocation28_spill] sm:$0xff] %v4413_v15  ;;  %2017 = vmatpush.bf16.msrb.mxu1 %v3422_v27  ;;  %v3427_v27 = vld [vmem:[#allocation7 + $0x90] sm:$0xff] }
 0x120   : > { %5007 = vst [vmem:[#allocation29_spill] sm:$0xff] %v4416_v14  ;;  %v658_v56 = vmax.f32 %v642_v17, 0.0  ;;  %2067 = vmatpush.bf16.msrb.mxu2 %v3429_v6 }
 0x122   : > { %v1300_v5 = vrot.slane %v658_v56, 1  ;;  %v4425_v54 = vpack.c.bf16 %v658_v56, %v657_v50  ;;  %v1219_v59 = vrot.slane %v658_v56, 7  ;;  %v3428_v50 = vld [vmem:[#allocation7 + $0x98] sm:$0xff]  ;;  %v1448_v56 = vmul.f32 %v4138_v35, %v4286_v33 }
 0x123   : > { %v597_v42 = vpop.f32.mrf.mxu3  ;;  %1703 = vmatmul.bf16.gmra.mxu1 %v1470_v8 }
 0x124   : > { %5008 = vst [vmem:[#allocation30_spill] sm:$0xff] %v4425_v54  ;;  %v623_v18 = vmul.f32 %v4038_v45, %v597_v42  ;;  %1757 = vmatmul.bf16.gmra.mxu2 %v4425_v54  ;;  %v4431_v38 = vsel %vm1224_vm5, %v1218_v31, %v1219_v59  ;;  %v4435_v17 = vsel %vm1305_vm4, %v1299_v24, %v1300_v5  ;;  %v3421_v42 = vld [vmem:[#allocation7 + $0x60] sm:$0xff] }
 0x125   : > { %v4439_v44 = vmul.f32 %v4307_v4, %v4435_v17  ;;  %v4450_v6 = vmul.f32 %v4213_v19, %v4435_v17  ;;  %v1469_v8 = vpack.c.bf16 %v4351_v47, %v1448_v56  ;;  %2068 = vmatpush.bf16.msrb.mxu2 %v3428_v50  ;;  %2018 = vmatpush.bf16.msrb.mxu1 %v3421_v42  ;;  %v3425_v42 = vld [vmem:[#allocation7 + $0x80] sm:$0xff] }
 0x126   : > { %v643_v34 = vadd.f32 %v4049_v51, %v623_v18 }
 0x127   : > { %5009 = vst [vmem:[#allocation31_spill] sm:$0xff] %v4450_v6 }
 0x128   : > { %v659_v24 = vmax.f32 %v643_v34, 0.0  ;;  %v3426_v34 = vld [vmem:[#allocation7 + $0x88] sm:$0xff] }
 0x129   : > { %2069 = vmatpush.bf16.msrb.mxu2 %v3427_v27 }
 0x12a   : > { %v1220_v20 = vrot.slane %v659_v24, 7  ;;  %v1301_v18 = vrot.slane %v659_v24, 1 }
 0x12b   : > { %v599_v1 = vpop.f32.mrf.mxu3  ;;  %1796 = vmatmul.bf16.gmra.mxu3 %v1469_v8 }
 0x12c   : > { %v624_v11 = vmul.f32 %v4038_v45, %v599_v1  ;;  %v1228_v31 = vsel %vm1224_vm5, %v1219_v59, %v1220_v20  ;;  %v1309_v35 = vsel %vm1305_vm4, %v1300_v5, %v1301_v18  ;;  %v1436_v1 = vmul.f32 %v4338_v40, %v1230_v62  ;;  %v3418_v5 = vld [vmem:[#allocation7 + $0x48] sm:$0xff] }
 0x12d   : > { %v4458_v33 = vmul.f32 0.0, %v1309_v35  ;;  %v4461_v50 = vmul.f32 %v4338_v40, %v1228_v31  ;;  %v4464_v56 = vmul.f32 %v4367_v41, %v1228_v31  ;;  %2070 = vmatpush.bf16.msrb.mxu2 %v3426_v34 }
 0x12e   : > { %v644_v8 = vadd.f32 %v4049_v51, %v624_v11  ;;  %v1473_v35 = vpack.c.bf16 %v4431_v38, %v1436_v1  ;;  %v3420_v11 = vld [vmem:[#allocation7 + $0x58] sm:$0xff] }
 0x12f   : > { %5010 = vst [vmem:[#allocation32_spill] sm:$0xff] %v4464_v56  ;;  %2019 = vmatpush.bf16.msrb.mxu1 %v3420_v11 }
 0x130   : > { %v660_v27 = vmax.f32 %v644_v8, 0.0 }
 0x131   : > { %2071 = vmatpush.bf16.msrb.mxu2 %v3425_v42 }
 0x132   : > { %v1302_v14 = vrot.slane %v660_v27, 1  ;;  %v4473_v54 = vpack.c.bf16 %v660_v27, %v659_v24  ;;  %v1221_v15 = vrot.slane %v660_v27, 7  ;;  %v3419_v24 = vld [vmem:[#allocation7 + $0x50] sm:$0xff] }
 0x133   : > { %v602_v10 = vpop.f32.mrf.mxu3  ;;  %1708 = vmatmul.bf16.gmra.mxu1 %v1473_v35 }
 0x134   : > { %v625_v40 = vmul.f32 %v4038_v45, %v602_v10  ;;  %1762 = vmatmul.bf16.gmra.mxu2 %v4473_v54  ;;  %v4479_v62 = vsel %vm1224_vm5, %v1220_v20, %v1221_v15  ;;  %v4483_v8 = vsel %vm1305_vm4, %v1301_v18, %v1302_v14  ;;  %v1450_v20 = vmul.f32 %v4213_v19, %v4387_v28  ;;  %v3464_v10 = vld [vmem:[#allocation7 + $0x1b8] sm:$0xff] }
 0x135   : > { %v4492_v27 = vmul.f32 %v4377_v52, %v4483_v8  ;;  %2020 = vmatpush.bf16.msrb.mxu1 %v3419_v24  ;;  %2410 = vmatpush.bf16.msra.mxu3 %v3464_v10  ;;  %v3417_v24 = vld [vmem:[#allocation7 + $0x40] sm:$0xff] }
 0x136   : > { %v645_v34 = vadd.f32 %v4049_v51, %v625_v40  ;;  %v1472_v35 = vpack.c.bf16 %v4410_v46, %v1450_v20  ;;  %v4512_v20 = vmul.f32 %v4145_v37, %v4483_v8 }
 0x138   : > { %v4496_v18 = vmax.f32 %v645_v34, 0.0  ;;  %v3463_v34 = vld [vmem:[#allocation7 + $0x1b0] sm:$0xff] }
 0x139   : > { %2021 = vmatpush.bf16.msrb.mxu1 %v3418_v5  ;;  %2411 = vmatpush.bf16.msra.mxu3 %v3463_v34 }
 0x13a   : > { %v1303_v42 = vrot.slane %v4496_v18, 1  ;;  %v1222_v11 = vrot.slane %v4496_v18, 7 }
 0x13b   : > { %v604_v40 = vpop.f32.mrf.mxu3  ;;  %1801 = vmatmul.bf16.gmra.mxu3 %v1472_v35  ;;  %v1438_v35 = vmul.f32 %v4263_v63, %v1228_v31 }
 0x13c   : > { %v626_v1 = vmul.f32 %v4038_v45, %v604_v40  ;;  %v4504_v59 = vsel %vm1224_vm5, %v1221_v15, %v1222_v11  ;;  %v1307_v19 = vsel %vm1305_vm4, %v1302_v14, %v1303_v42  ;;  %v3461_v14 = vld [vmem:[#allocation7 + $0x1a0] sm:$0xff] }
 0x13d   : > { %v4508_v28 = vmul.f32 0.0, %v1307_v19  ;;  %v4516_v45 = vmul.f32 %v4263_v63, %v4504_v59  ;;  %v1476_v40 = vpack.c.bf16 %v4479_v62, %v1438_v35  ;;  %2022 = vmatpush.bf16.msrb.mxu1 %v3417_v24  ;;  %v5011_v63 = vrot.slane %v4058_v61, 7 }
 0x13e   : > { %v646_v15 = vadd.f32 %v4049_v51, %v626_v1  ;;  %v2127_v51 = vmul.f32 0.0, %v4367_v41  ;;  %v5012_v24 = vrot.slane %v4058_v61, 1  ;;  %v1452_v61 = vmul.f32 %v4377_v52, %v4435_v17  ;;  %v3460_v52 = vld [vmem:[#allocation7 + $0x198] sm:$0xff]  ;;  %v3415_v17 = vld [vmem:[#allocation7 + $0x30] sm:$0xff] }
 0x140   : > { %v662_v10 = vmax.f32 %v646_v15, 0.0  ;;  %v3462_v15 = vld [vmem:[#allocation7 + $0x1a8] sm:$0xff] }
 0x141   : > { %2412 = vmatpush.bf16.msra.mxu3 %v3462_v15 }
 0x142   : > { %v1223_v19 = vrot.slane %v662_v10, 7  ;;  %v1304_v6 = vrot.slane %v662_v10, 1  ;;  %v4526_v56 = vpack.c.bf16 %v662_v10, %v4496_v18 }
 0x143   : > { %1713 = vmatmul.bf16.gmra.mxu1 %v1476_v40 }
 0x144   : > { %1767 = vmatmul.bf16.gmra.mxu2 %v4526_v56  ;;  %v1240_v31 = vsel %vm1224_vm5, %v1223_v19, %v5011_v63  ;;  %v4536_v1 = vsel %vm1224_vm5, %v1222_v11, %v1223_v19  ;;  %v1321_v34 = vsel %vm1305_vm4, %v1304_v6, %v5012_v24  ;;  %v1306_v40 = vsel %vm1305_vm4, %v1303_v42, %v1304_v6  ;;  %v3416_v42 = vld [vmem:[#allocation7 + $0x38] sm:$0xff] }
 0x145   : > { %v1426_v35 = vmul.f32 %v4110_v23, %v1240_v31  ;;  %v4545_v5 = vmul.f32 0.0, %v1321_v34  ;;  %v4548_v63 = vmul.f32 %v4042_v48, %v1240_v31  ;;  %v2211_v19 = vpack.c.bf16 %v4536_v1, %v4516_v45  ;;  %2413 = vmatpush.bf16.msra.mxu3 %v3461_v14  ;;  %v3458_v14 = vld [vmem:[#allocation7 + $0x188] sm:$0xff] }
 0x146   : > { %v4555_v24 = vmul.f32 %v2127_v51, %v1240_v31  ;;  %v4558_v39 = vmul.f32 %v4307_v4, %v1306_v40  ;;  %v1475_v6 = vpack.c.bf16 %v4458_v33, %v1452_v61  ;;  %v1322_v48 = vmul.f32 0.0, %v4071_v3  ;;  %v3459_v51 = vld [vmem:[#allocation7 + $0x190] sm:$0xff]  ;;  %v3413_v61 = vld [vmem:[#allocation7 + $0x20] sm:$0xff] }
 0x147   : > { %v1458_v11 = vpack.c.bf16 %v4116_v25, %v1426_v35  ;;  %v1440_v31 = vmul.f32 %v4367_v41, %v4504_v59  ;;  %v3414_v35 = vld [vmem:[#allocation7 + $0x28] sm:$0xff]  ;;  %v5013_v41 = vpack.c.bf16 %v4251_v32, %v4192_v0  ;;  %v3409_v0 = vld [vmem:[#allocation7] sm:$0xff] }
 0x148   : > { %v2213_v34 = vpack.c.bf16 %v4545_v5, %v4558_v39  ;;  %v1338_v15 = vmul.f32 %v1322_v48, %v1306_v40 }
 0x149   : > { %1683 = vmatmul.bf16.vlgmr.msrb.gmra.mxu0 %v1458_v11  ;;  %2414 = vmatpush.bf16.msra.mxu3 %v3460_v52  ;;  %v1479_v11 = vpack.c.bf16 %v4536_v1, %v1440_v31  ;;  %v3412_v52 = vld [vmem:[#allocation7 + $0x18] sm:$0xff] }
 0x14a   : > { %1966 = vmatpush.bf16.msrb.mxu0 %v3416_v42  ;;  %v1356_v3 = vpack.c.bf16 %v4545_v5, %v1338_v15  ;;  %v3457_v42 = vld [vmem:[#allocation7 + $0x180] sm:$0xff]  ;;  %v1274_v15 = vmul.f32 0.0, %v662_v10  ;;  %v3472_v10 = vld [vmem:[#allocation7 + $0x1f8] sm:$0xff] }
 0x14b   : > { %1806 = vmatmul.bf16.gmra.mxu3 %v1475_v6  ;;  %v1454_v6 = vmul.f32 %v4307_v4, %v4483_v8  ;;  %v5014_v4 = vpack.c.bf16 %v4178_v55, %v4142_v36  ;;  %v1456_v8 = vmul.f32 %v4145_v37, %v1306_v40  ;;  %v3471_v37 = vld [vmem:[#allocation7 + $0x1f0] sm:$0xff]  ;;  %v5016_v40 = vpack.c.bf16 %v4251_v32, %v4196_v2 }
 0x14d   : > { %2415 = vmatpush.bf16.msra.mxu3 %v3459_v51  ;;  %v1478_v48 = vpack.c.bf16 %v4508_v28, %v1454_v6  ;;  %v1273_v51 = vmul.f32 0.0, %v4496_v18  ;;  %v3480_v18 = vld [vmem:[#allocation7 + $0x238] sm:$0xff] }
 0x14e   : > { %1967 = vmatpush.bf16.msrb.mxu0 %v3415_v17  ;;  %v3411_v17 = vld [vmem:[#allocation7 + $0x10] sm:$0xff]  ;;  %2508 = vmatpush.bf16.msra.mxu1 %v3480_v18 }
 0x14f   : > { %v1355_v31 = vpack.c.bf16 %v1274_v15, %v1273_v51 }
 0x151   : > { %2416 = vmatpush.bf16.msra.mxu3 %v3458_v14  ;;  %v3479_v14 = vld [vmem:[#allocation7 + $0x230] sm:$0xff] }
 0x152   : > { %1968 = vmatpush.bf16.msrb.mxu0 %v3414_v35  ;;  %v3410_v35 = vld [vmem:[#allocation7 + $0x8] sm:$0xff]  ;;  %2509 = vmatpush.bf16.msra.mxu1 %v3479_v14  ;;  %v3477_v14 = vld [vmem:[#allocation7 + $0x220] sm:$0xff] }
 0x153   : > { %1718 = vmatmul.bf16.gmra.mxu1 %v1479_v11  ;;  %v1481_v11 = vpack.c.bf16 %v4545_v5, %v1456_v8 }
 0x154   : > { %2072 = vmatmul.bf16.vlgmr.msrb.gmra.mxu2 %v1356_v3  ;;  %v5015_v3 = vpack.c.bf16 %v4242_v60, %v4273_v53  ;;  %v1258_v53 = vmul.f32 0.0, %v4536_v1  ;;  %v5040_v1 = vld [vmem:[#allocation29_spill] sm:$0xff] }
 0x155   : > { %2417 = vmatpush.bf16.msra.mxu3 %v3457_v42 }
 0x156   : > { %1969 = vmatpush.bf16.msrb.mxu0 %v3413_v61 }
 0x159   : > { %1688 = vmatmul.bf16.gmra.mxu0 %v5013_v41 }
 0x15a   : > { %1970 = vmatpush.bf16.msrb.mxu0 %v3412_v52 }
 0x15b   : > { %1811 = vmatmul.bf16.gmra.mxu3 %v1478_v48  ;;  %v5017_v48 = vpack.c.bf16 %v4247_v16, %v4187_v58 }
 0x15e   : > { %1971 = vmatpush.bf16.msrb.mxu0 %v3411_v17 }
 0x162   : > { %1972 = vmatpush.bf16.msrb.mxu0 %v3410_v35  ;;  %v3470_v35 = vld [vmem:[#allocation7 + $0x1e8] sm:$0xff] }
 0x163   : > { %2023 = vmatmul.bf16.vlgmr.msrb.gmra.mxu1 %v1355_v31 }
 0x164   : > { %2077 = vmatmul.bf16.gmra.mxu2 %v5014_v4  ;;  %v3478_v4 = vld [vmem:[#allocation7 + $0x228] sm:$0xff] }
 0x165   : > { %2510 = vmatpush.bf16.msra.mxu1 %v3478_v4 }
 0x166   : > { %1973 = vmatpush.bf16.msrb.mxu0 %v3409_v0 }
 0x169   : > { %1732 = vmatmul.bf16.vlgmr.msra.gmra.mxu0 %v4107_v22  ;;  %2511 = vmatpush.bf16.msra.mxu1 %v3477_v14 }
 0x16a   : > { %2459 = vmatpush.bf16.msra.mxu0 %v3472_v10 }
 0x16b   : > { %1816 = vmatmul.bf16.gmra.mxu3 %v1481_v11  ;;  %v5019_v11 = vpack.c.bf16 %v4351_v47, %v4302_v9 }
 0x16e   : > { %2460 = vmatpush.bf16.msra.mxu0 %v3471_v37  ;;  %v3469_v37 = vld [vmem:[#allocation7 + $0x1e0] sm:$0xff] }
 0x172   : > { %2461 = vmatpush.bf16.msra.mxu0 %v3470_v35 }
 0x173   : > { %2028 = vmatmul.bf16.gmra.mxu1 %v4107_v22  ;;  %v1241_v22 = vmul.f32 0.0, %v4110_v23  ;;  %v5018_v23 = vpack.c.bf16 %v4240_v26, %v4294_v12  ;;  %v1357_v12 = vpack.c.bf16 %v4116_v25, %v4548_v63  ;;  %v5021_v63 = vpack.c.bf16 %v4410_v46, %v4391_v43 }
 0x174   : > { %2082 = vmatmul.bf16.gmra.mxu2 %v5015_v3 }
 0x175   : > { %v1257_v2 = vmul.f32 %v1241_v22, %v4504_v59 }
 0x176   : > { %2462 = vmatpush.bf16.msra.mxu0 %v3469_v37 }
 0x177   : > { %v1743_v36 = vpop.f32.mrf.mxu2  ;;  %v1354_v15 = vpack.c.bf16 %v1258_v53, %v1257_v2 }
 0x179   : > { %1737 = vmatmul.bf16.gmra.mxu0 %v4276_v57 }
 0x17b   : > { %2418 = vmatmul.bf16.vlgmr.msra.gmra.mxu3 %v5016_v40  ;;  %v5020_v40 = vpack.c.bf16 %v4282_v13, %v4228_v49 }
 0x17e   : > { %v4589_v61 = vpop.f32.mrf.mxu3 }
 0x17f   : > { %v1745_v6 = vpop.f32.mrf.mxu2 }
 0x180   : > { %v1694_v42 = vpop.f32.mrf.mxu1 }
 0x181   : > { %v1744_v41 = vadd.f32 %v1743_v36, %v1694_v42 }
 0x183   : > { %2033 = vmatmul.bf16.gmra.mxu1 %v4276_v57 }
 0x184   : > { %2087 = vmatmul.bf16.gmra.mxu2 %v5017_v48 }
 0x186   : > { %v4598_v52 = vpop.f32.mrf.mxu3 }
 0x187   : > { %v1748_v17 = vpop.f32.mrf.mxu2 }
 0x188   : > { %v1696_v51 = vpop.f32.mrf.mxu1 }
 0x189   : > { %v1746_v31 = vadd.f32 %v1745_v6, %v1696_v51  ;;  %1974 = vmatmul.bf16.vlgmr.msrb.gmra.mxu0 %v1354_v15  ;;  %v5022_v15 = vpack.c.bf16 %v4251_v32, %v4200_v7  ;;  %v5023_v51 = vld [vmem:[#allocation24_spill] sm:$0xff]  ;;  %v5026_v7 = vpack.c.bf16 %v4458_v33, %v4439_v44 }
 0x18a   : > { %v5024_v35 = vpack.c.bf16 %v4383_v21, %v5023_v51 }
 0x18b   : > { %2423 = vmatmul.bf16.gmra.mxu3 %v5018_v23  ;;  %v3476_v23 = vld [vmem:[#allocation7 + $0x218] sm:$0xff] }
 0x18c   : > { %2512 = vmatpush.bf16.msra.mxu1 %v3476_v23 }
 0x18e   : > { %v4603_v0 = vpop.f32.mrf.mxu3 }
 0x18f   : > { %v1750_v58 = vpop.f32.mrf.mxu2 }
 0x190   : > { %v1699_v8 = vpop.f32.mrf.mxu1 }
 0x191   : > { %v1749_v59 = vadd.f32 %v1748_v17, %v1699_v8 }
 0x193   : > { %2038 = vmatmul.bf16.gmra.mxu1 %v4125_v29 }
 0x194   : > { %2092 = vmatmul.bf16.gmra.mxu2 %v5019_v11  ;;  %v5025_v11 = vld [vmem:[#allocation26_spill] sm:$0xff] }
 0x196   : > { %v4609_v10 = vpop.f32.mrf.mxu3 }
 0x197   : > { %v1753_v18 = vpop.f32.mrf.mxu2 }
 0x198   : > { %v1701_v3 = vpop.f32.mrf.mxu1 }
 0x199   : > { %v1751_v36 = vadd.f32 %v1750_v58, %v1701_v3  ;;  %1979 = vmatmul.bf16.gmra.mxu0 %v1357_v12  ;;  %v5027_v3 = vld [vmem:[#allocation19_spill] sm:$0xff] }
 0x19a   : > { %v5028_v37 = vpack.c.bf16 %v4240_v26, %v5027_v3  ;;  %v5032_v26 = vpack.c.bf16 %v4508_v28, %v4512_v20  ;;  %v3466_v3 = vld [vmem:[#allocation7 + $0x1c8] sm:$0xff] }
 0x19b   : > { %2428 = vmatmul.bf16.gmra.mxu3 %v5020_v40  ;;  %v3475_v40 = vld [vmem:[#allocation7 + $0x210] sm:$0xff] }
 0x19c   : > { %2513 = vmatpush.bf16.msra.mxu1 %v3475_v40 }
 0x19e   : > { %v1792_v6 = vpop.f32.mrf.mxu3 }
 0x19f   : > { %v4616_v9 = vadd.f32 %v1792_v6, %v1744_v41  ;;  %v1755_v42 = vpop.f32.mrf.mxu2  ;;  %v3468_v41 = vld [vmem:[#allocation7 + $0x1d8] sm:$0xff]  ;;  %v5029_v6 = vld [vmem:[#allocation28_spill] sm:$0xff] }
 0x1a0   : > { %v1704_v22 = vpop.f32.mrf.mxu1  ;;  %2463 = vmatpush.bf16.msra.mxu0 %v3468_v41  ;;  %v5031_v41 = vld [vmem:[#allocation30_spill] sm:$0xff] }
 0x1a1   : > { %v1754_v53 = vadd.f32 %v1753_v18, %v1704_v22  ;;  %v5030_v22 = vpack.c.bf16 %v4431_v38, %v5029_v6 }
 0x1a3   : > { %2043 = vmatmul.bf16.gmra.mxu1 %v4265_v30 }
 0x1a4   : > { %2097 = vmatmul.bf16.gmra.mxu2 %v5021_v63  ;;  %v3474_v63 = vld [vmem:[#allocation7 + $0x208] sm:$0xff] }
 0x1a5   : > { %2514 = vmatpush.bf16.msra.mxu1 %v3474_v63 }
 0x1a6   : > { %v1794_v48 = vpop.f32.mrf.mxu3 }
 0x1a7   : > { %v4622_v2 = vadd.f32 %v1794_v48, %v1746_v31  ;;  %v1758_v49 = vpop.f32.mrf.mxu2 }
 0x1a8   : > { %v1706_v17 = vpop.f32.mrf.mxu1 }
 0x1a9   : > { %1984 = vmatmul.bf16.gmra.mxu0 %v5022_v15  ;;  %v1756_v51 = vadd.f32 %v1755_v42, %v1706_v17 }
 0x1ab   : > { %2433 = vmatmul.bf16.gmra.mxu3 %v5024_v35 }
 0x1ae   : > { %v1797_v4 = vpop.f32.mrf.mxu3 }
 0x1af   : > { %v4630_v43 = vadd.f32 %v1797_v4, %v1749_v59  ;;  %v1760_v31 = vpop.f32.mrf.mxu2  ;;  %v3467_v59 = vld [vmem:[#allocation7 + $0x1d0] sm:$0xff] }
 0x1b0   : > { %v1709_v58 = vpop.f32.mrf.mxu1  ;;  %2464 = vmatpush.bf16.msra.mxu0 %v3467_v59 }
 0x1b1   : > { %v1759_v8 = vadd.f32 %v1758_v49, %v1709_v58  ;;  %v3473_v49 = vld [vmem:[#allocation7 + $0x200] sm:$0xff] }
 0x1b2   : > { %2515 = vmatpush.bf16.msra.mxu1 %v3473_v49  ;;  %v3465_v49 = vld [vmem:[#allocation7 + $0x1c0] sm:$0xff] }
 0x1b3   : > { %2048 = vmatmul.bf16.gmra.mxu1 %v5025_v11 }
 0x1b4   : > { %2102 = vmatmul.bf16.gmra.mxu2 %v5026_v7  ;;  %2465 = vmatpush.bf16.msra.mxu0 %v3466_v3 }
 0x1b6   : > { %v1799_v32 = vpop.f32.mrf.mxu3 }
 0x1b7   : > { %v4636_v18 = vadd.f32 %v1799_v32, %v1751_v36  ;;  %v1763_v14 = vpop.f32.mrf.mxu2 }
 0x1b8   : > { %v1711_v12 = vpop.f32.mrf.mxu1  ;;  %2466 = vmatpush.bf16.msra.mxu0 %v3465_v49 }
 0x1b9   : > { %1989 = vmatmul.bf16.gmra.mxu0 %v5028_v37  ;;  %v5035_v37 = vpack.c.bf16 %v4479_v62, %v4461_v50  ;;  %v1761_v6 = vadd.f32 %v1760_v31, %v1711_v12  ;;  %v5038_v12 = vld [vmem:[#allocation17_spill] sm:$0xff] }
 0x1bb   : > { %2438 = vmatmul.bf16.gmra.mxu3 %v5030_v22 }
 0x1be   : > { %v1802_v44 = vpop.f32.mrf.mxu3 }
 0x1bf   : > { %v4644_v48 = vadd.f32 %v1802_v44, %v1754_v53  ;;  %v1765_v35 = vpop.f32.mrf.mxu2  ;;  %v5033_v53 = vld [vmem:[#allocation20_spill] sm:$0xff] }
 0x1c0   : > { %v1714_v36 = vpop.f32.mrf.mxu1  ;;  %v5034_v32 = vpack.c.bf16 %v4282_v13, %v5033_v53 }
 0x1c1   : > { %v1764_v15 = vadd.f32 %v1763_v14, %v1714_v36  ;;  %v5036_v36 = vld [vmem:[#allocation25_spill] sm:$0xff] }
 0x1c2   : > { %v5037_v50 = vpack.c.bf16 %v4383_v21, %v5036_v36 }
 0x1c3   : > { %2053 = vmatmul.bf16.gmra.mxu1 %v5031_v41 }
 0x1c4   : > { %2107 = vmatmul.bf16.gmra.mxu2 %v5032_v26 }
 0x1c6   : > { %v1684_v23 = vpop.f32.mrf.mxu0  ;;  %v1804_v4 = vpop.f32.mrf.mxu3 }
 0x1c7   : > { %v4650_v58 = vadd.f32 %v1804_v4, %v1756_v51  ;;  %v1768_v42 = vpop.f32.mrf.mxu2  ;;  %v5039_v4 = vpack.c.bf16 %v4242_v60, %v5038_v12 }
 0x1c8   : > { %v1716_v7 = vpop.f32.mrf.mxu1 }
 0x1c9   : > { %1994 = vmatmul.bf16.gmra.mxu0 %v5034_v32  ;;  %v1766_v53 = vadd.f32 %v1765_v35, %v1716_v7 }
 0x1cb   : > { %2443 = vmatmul.bf16.gmra.mxu3 %v5035_v37 }
 0x1ce   : > { %v1686_v20 = vpop.f32.mrf.mxu0  ;;  %v1807_v40 = vpop.f32.mrf.mxu3 }
 0x1cf   : > { %v4658_v59 = vadd.f32 %v1807_v40, %v1759_v8  ;;  %v2144_v40 = vmul.f32 0.0, %v4116_v25 }
 0x1d0   : > { %v1719_v17 = vpop.f32.mrf.mxu1 }
 0x1d1   : > { %v1769_v14 = vadd.f32 %v1768_v42, %v1719_v17 }
 0x1d3   : > { %2058 = vmatmul.bf16.gmra.mxu1 %v4473_v54 }
 0x1d6   : > { %v1689_v22 = vpop.f32.mrf.mxu0  ;;  %v1809_v63 = vpop.f32.mrf.mxu3 }
 0x1d7   : > { %v4661_v13 = vadd.f32 %v1809_v63, %v1761_v6  ;;  %v1770_v63 = vpop.f32.mrf.mxu2 }
 0x1d8   : > { %v1721_v44 = vpop.f32.mrf.mxu1 }
 0x1d9   : > { %1999 = vmatmul.bf16.gmra.mxu0 %v5037_v50  ;;  %v1771_v25 = vadd.f32 %v1770_v63, %v1721_v44 }
 0x1db   : > { %2448 = vmatmul.bf16.gmra.mxu3 %v2211_v19  ;;  %v5041_v19 = vpack.c.bf16 %v4431_v38, %v5040_v1 }
 0x1de   : > { %v1691_v8 = vpop.f32.mrf.mxu0  ;;  %v1812_v26 = vpop.f32.mrf.mxu3 }
 0x1df   : > { %v4669_v51 = vadd.f32 %v1812_v26, %v1764_v15  ;;  %v2214_v15 = vpack.c.bf16 %v2144_v40, %v4555_v24  ;;  %v5044_v24 = vld [vmem:[#allocation32_spill] sm:$0xff] }
 0x1e0   : > { %v2024_v31 = vpop.f32.mrf.mxu1  ;;  %v5045_v12 = vpack.c.bf16 %v4479_v62, %v5044_v24  ;;  %v3487_v62 = vld [vmem:[#allocation8 + $0x30] sm:$0xff] }
 0x1e3   : > { %2516 = vmatmul.bf16.vlgmr.msra.gmra.mxu1 %v5039_v4 }
 0x1e6   : > { %v1733_v32 = vpop.f32.mrf.mxu0  ;;  %v1814_v3 = vpop.f32.mrf.mxu3 }
 0x1e7   : > { %v1734_v21 = vadd.f32 %v1733_v32, %v1684_v23  ;;  %v4674_v37 = vadd.f32 %v1814_v3, %v1766_v53  ;;  %v5042_v23 = vld [vmem:[#allocation16_spill] sm:$0xff] }
 0x1e8   : > { %v2026_v45 = vpop.f32.mrf.mxu1  ;;  %v5043_v7 = vpack.c.bf16 %v4247_v16, %v5042_v23  ;;  %v5046_v16 = vld [vmem:[#allocation21_spill] sm:$0xff] }
 0x1e9   : > { %2004 = vmatmul.bf16.gmra.mxu0 %v5041_v19  ;;  %v5047_v32 = vpack.c.bf16 %v4351_v47, %v5046_v16  ;;  %v1783_v44 = vadd.f32 %v4589_v61, %v1734_v21  ;;  %v5048_v47 = vld [vmem:[#allocation27_spill] sm:$0xff] }
 0x1ea   : > { %v5049_v23 = vpack.c.bf16 %v4410_v46, %v5048_v47  ;;  %v5050_v46 = vld [vmem:[#allocation31_spill] sm:$0xff] }
 0x1eb   : > { %2453 = vmatmul.bf16.gmra.mxu3 %v2214_v15 }
 0x1ee   : > { %v1735_v42 = vpop.f32.mrf.mxu0  ;;  %v1817_v17 = vpop.f32.mrf.mxu3 }
 0x1ef   : > { %v1736_v60 = vadd.f32 %v1735_v42, %v1686_v20  ;;  %v4681_v6 = vadd.f32 %v1817_v17, %v1769_v14  ;;  %v3488_v20 = vld [vmem:[#allocation8 + $0x38] sm:$0xff] }
 0x1f0   : > { %v2029_v35 = vpop.f32.mrf.mxu1  ;;  %2701 = vmatpush.bf16.msra.mxu2 %v3488_v20 }
 0x1f1   : > { %v1785_v19 = vadd.f32 %v4598_v52, %v1736_v60 }
 0x1f3   : > { %2521 = vmatmul.bf16.gmra.mxu1 %v5043_v7 }
 0x1f4   : > { %2702 = vmatpush.bf16.msra.mxu2 %v3487_v62  ;;  %v5053_v62 = vld [vmem:[#allocation22_spill] sm:$0xff] }
 0x1f6   : > { %v1738_v36 = vpop.f32.mrf.mxu0  ;;  %v1819_v50 = vpop.f32.mrf.mxu3 }
 0x1f7   : > { %v1739_v49 = vadd.f32 %v1738_v36, %v1689_v22  ;;  %v4686_v38 = vadd.f32 %v1819_v50, %v1771_v25  ;;  %v5051_v50 = vpack.c.bf16 %v4458_v33, %v5050_v46  ;;  %v5052_v33 = vpack.c.bf16 %v4508_v28, %v4492_v27  ;;  %v5055_v46 = vld [vmem:[#allocation23_spill] sm:$0xff] }
 0x1f8   : > { %v2031_v26 = vpop.f32.mrf.mxu1 }
 0x1f9   : > { %2009 = vmatmul.bf16.gmra.mxu0 %v5045_v12  ;;  %v1788_v61 = vadd.f32 %v4603_v0, %v1739_v49 }
 0x1fe   : > { %v1740_v14 = vpop.f32.mrf.mxu0 }
 0x1ff   : > { %v1741_v4 = vadd.f32 %v1740_v14, %v1691_v8 }
 0x200   : > { %v2034_v53 = vpop.f32.mrf.mxu1 }
 0x201   : > { %v1790_v52 = vadd.f32 %v4609_v10, %v1741_v4 }
 0x203   : > { %2526 = vmatmul.bf16.gmra.mxu1 %v5047_v32 }
 0x206   : > { %v1975_v3 = vpop.f32.mrf.mxu0 }
 0x207   : > { %v1976_v22 = vadd.f32 %v1975_v3, %v1783_v44 }
 0x208   : > { %v2036_v40 = vpop.f32.mrf.mxu1 }
 0x209   : > { %v4695_v1 = vadd.f32 %v2024_v31, %v1976_v22  ;;  %2467 = vmatmul.bf16.vlgmr.msra.gmra.mxu0 %v4276_v57  ;;  %v3486_v57 = vld [vmem:[#allocation8 + $0x28] sm:$0xff] }
 0x20a   : > { %2703 = vmatpush.bf16.msra.mxu2 %v3486_v57  ;;  %v3481_v57 = vld [vmem:[#allocation8] sm:$0xff] }
 0x20e   : > { %v1977_v15 = vpop.f32.mrf.mxu0 }
 0x20f   : > { %v1978_v8 = vadd.f32 %v1977_v15, %v1785_v19  ;;  %v5054_v19 = vpack.c.bf16 %v4178_v55, %v5053_v62 }
 0x210   : > { %v2039_v42 = vpop.f32.mrf.mxu1 }
 0x211   : > { %v4699_v17 = vadd.f32 %v2026_v45, %v1978_v8 }
 0x213   : > { %2531 = vmatmul.bf16.gmra.mxu1 %v5049_v23  ;;  %v2419_v23 = vpop.f32.mrf.mxu3 }
 0x216   : > { %v1980_v21 = vpop.f32.mrf.mxu0 }
 0x217   : > { %v1981_v31 = vadd.f32 %v1980_v21, %v1788_v61  ;;  %v2073_v61 = vpop.f32.mrf.mxu2 }
 0x218   : > { %v2041_v7 = vpop.f32.mrf.mxu1 }
 0x219   : > { %v4705_v63 = vadd.f32 %v2029_v35, %v1981_v31  ;;  %2472 = vmatmul.bf16.gmra.mxu0 %v4125_v29  ;;  %v3485_v29 = vld [vmem:[#allocation8 + $0x20] sm:$0xff] }
 0x21a   : > { %2704 = vmatpush.bf16.msra.mxu2 %v3485_v29 }
 0x21e   : > { %v1982_v60 = vpop.f32.mrf.mxu0 }
 0x21f   : > { %v1983_v45 = vadd.f32 %v1982_v60, %v1790_v52  ;;  %v2075_v52 = vpop.f32.mrf.mxu2 }
 0x220   : > { %v2044_v25 = vpop.f32.mrf.mxu1 }
 0x221   : > { %v4709_v36 = vadd.f32 %v2031_v26, %v1983_v45 }
 0x223   : > { %2536 = vmatmul.bf16.gmra.mxu1 %v5051_v50  ;;  %v5056_v50 = vld [vmem:[#allocation18_spill] sm:$0xff] }
 0x226   : > { %v1985_v0 = vpop.f32.mrf.mxu0 }
 0x227   : > { %v1986_v49 = vadd.f32 %v1985_v0, %v4616_v9  ;;  %v5057_v0 = vpack.c.bf16 %v5055_v46, %v5056_v50 }
 0x228   : > { %v2046_v35 = vpop.f32.mrf.mxu1 }
 0x229   : > { %v4715_v24 = vadd.f32 %v2034_v53, %v1986_v49  ;;  %2477 = vmatmul.bf16.gmra.mxu0 %v4265_v30  ;;  %v3484_v30 = vld [vmem:[#allocation8 + $0x18] sm:$0xff]  ;;  %v2078_v49 = vpop.f32.mrf.mxu2 }
 0x22a   : > { %2705 = vmatpush.bf16.msra.mxu2 %v3484_v30 }
 0x22e   : > { %v1987_v10 = vpop.f32.mrf.mxu0 }
 0x22f   : > { %v1988_v12 = vadd.f32 %v1987_v10, %v4622_v2 }
 0x230   : > { %v2049_v20 = vpop.f32.mrf.mxu1 }
 0x231   : > { %v4719_v26 = vadd.f32 %v2036_v40, %v1988_v12 }
 0x233   : > { %2541 = vmatmul.bf16.gmra.mxu1 %v5052_v33  ;;  %v2080_v33 = vpop.f32.mrf.mxu2 }
 0x236   : > { %v1990_v14 = vpop.f32.mrf.mxu0 }
 0x237   : > { %v1991_v9 = vadd.f32 %v1990_v14, %v4630_v43 }
 0x238   : > { %v2051_v4 = vpop.f32.mrf.mxu1 }
 0x239   : > { %v4725_v53 = vadd.f32 %v2039_v42, %v1991_v9  ;;  %2482 = vmatmul.bf16.gmra.mxu0 %v5025_v11  ;;  %v3483_v11 = vld [vmem:[#allocation8 + $0x10] sm:$0xff] }
 0x23a   : > { %2706 = vmatpush.bf16.msra.mxu2 %v3483_v11 }
 0x23e   : > { %v1992_v16 = vpop.f32.mrf.mxu0 }
 0x23f   : > { %v1993_v2 = vadd.f32 %v1992_v16, %v4636_v18  ;;  %v4771_v16 = vld [vmem:[%s4933_s5] ss:$0 sm:$0xff] }
 0x240   : > { %v2054_v44 = vpop.f32.mrf.mxu1 }
 0x241   : > { %v4729_v32 = vadd.f32 %v2041_v7, %v1993_v2 }
 0x243   : > { %2546 = vmatmul.bf16.gmra.mxu1 %v2213_v34 }
 0x246   : > { %v1995_v27 = vpop.f32.mrf.mxu0 }
 0x247   : > { %v1996_v28 = vadd.f32 %v1995_v27, %v4644_v48 }
 0x248   : > { %v2056_v3 = vpop.f32.mrf.mxu1 }
 0x249   : > { %v4735_v43 = vadd.f32 %v2044_v25, %v1996_v28  ;;  %2487 = vmatmul.bf16.gmra.mxu0 %v5031_v41  ;;  %v3482_v41 = vld [vmem:[#allocation8 + $0x8] sm:$0xff]  ;;  %v2076_v28 = vadd.f32 %v2075_v52, %v4699_v17 }
 0x24a   : > { %2707 = vmatpush.bf16.msra.mxu2 %v3482_v41 }
 0x24e   : > { %v1997_v22 = vpop.f32.mrf.mxu0  ;;  %2708 = vmatpush.bf16.msra.mxu2 %v3481_v57 }
 0x24f   : > { %v1998_v18 = vadd.f32 %v1997_v22, %v4650_v58 }
 0x250   : > { %v2059_v5 = vpop.f32.mrf.mxu1 }
 0x251   : > { %v4739_v40 = vadd.f32 %v2046_v35, %v1998_v18 }
 0x253   : > { %2551 = vmatmul.bf16.gmra.mxu1 %v5054_v19 }
 0x256   : > { %v2000_v39 = vpop.f32.mrf.mxu0 }
 0x257   : > { %v2001_v34 = vadd.f32 %v2000_v39, %v4658_v59 }
 0x258   : > { %v2061_v58 = vpop.f32.mrf.mxu1 }
 0x259   : > { %v4745_v48 = vadd.f32 %v2049_v20, %v2001_v34  ;;  %2492 = vmatmul.bf16.gmra.mxu0 %v4473_v54 }
 0x25e   : > { %v2002_v15 = vpop.f32.mrf.mxu0 }
 0x25f   : > { %v2003_v8 = vadd.f32 %v2002_v15, %v4661_v13  ;;  %v2421_v13 = vpop.f32.mrf.mxu3 }
 0x260   : > { %v2517_v59 = vpop.f32.mrf.mxu1 }
 0x261   : > { %v4749_v42 = vadd.f32 %v2051_v4, %v2003_v8  ;;  %v2074_v4 = vadd.f32 %v2073_v61, %v4695_v1 }
 0x266   : > { %v2005_v47 = vpop.f32.mrf.mxu0 }
 0x267   : > { %v2006_v55 = vadd.f32 %v2005_v47, %v4669_v51  ;;  %v2079_v47 = vadd.f32 %v2078_v49, %v4705_v63 }
 0x268   : > { %v2519_v60 = vpop.f32.mrf.mxu1 }
 0x269   : > { %v4752_v21 = vadd.f32 %v2054_v44, %v2006_v55  ;;  %2497 = vmatmul.bf16.gmra.mxu0 %v4526_v56  ;;  %v2424_v56 = vpop.f32.mrf.mxu3 }
 0x26e   : > { %v2007_v31 = vpop.f32.mrf.mxu0 }
 0x26f   : > { %v2008_v54 = vadd.f32 %v2007_v31, %v4674_v37 }
 0x270   : > { %v2522_v35 = vpop.f32.mrf.mxu1 }
 0x271   : > { %v4756_v7 = vadd.f32 %v2056_v3, %v2008_v54  ;;  %v2426_v12 = vpop.f32.mrf.mxu3  ;;  %v4778_v3 = vld [vmem:[%s4934_s6] ss:$0 sm:$0xff]  ;;  %v2081_v54 = vadd.f32 %v2080_v33, %v4709_v36 }
 0x276   : > { %v2010_v45 = vpop.f32.mrf.mxu0 }
 0x277   : > { %v2011_v51 = vadd.f32 %v2010_v45, %v4681_v6 }
 0x278   : > { %v2524_v9 = vpop.f32.mrf.mxu1 }
 0x279   : > { %v4759_v25 = vadd.f32 %v2059_v5, %v2011_v51  ;;  %2502 = vmatmul.bf16.gmra.mxu0 %v5057_v0  ;;  %v2429_v27 = vpop.f32.mrf.mxu3 }
 0x27e   : > { %v2012_v37 = vpop.f32.mrf.mxu0 }
 0x27f   : > { %v2013_v29 = vadd.f32 %v2012_v37, %v4686_v38  ;;  %v2083_v38 = vpop.f32.mrf.mxu2 }
 0x280   : > { %v2527_v22 = vpop.f32.mrf.mxu1  ;;  %v2084_v36 = vadd.f32 %v2083_v38, %v4715_v24 }
 0x281   : > { %v4765_v10 = vadd.f32 %v2061_v58, %v2013_v29  ;;  %v2431_v8 = vpop.f32.mrf.mxu3 }
 0x286   : > { %v2468_v20 = vpop.f32.mrf.mxu0 }
 0x287   : > { %v2469_v14 = vadd.f32 %v2468_v20, %v2419_v23  ;;  %v2085_v58 = vpop.f32.mrf.mxu2 }
 0x288   : > { %v2529_v23 = vpop.f32.mrf.mxu1 }
 0x289   : > { %v2518_v6 = vadd.f32 %v2517_v59, %v2469_v14 }
 0x28b   : > { %v2557_v30 = vadd.f32 %v2518_v6, %v2074_v4  ;;  %v2086_v4 = vadd.f32 %v2085_v58, %v4719_v26 }
 0x28d   : > { %v2577_v11 = vmul.f32 %v4771_v16, %v2557_v30 }
 0x28e   : > { %v2470_v2 = vpop.f32.mrf.mxu0 }
 0x28f   : > { %v2471_v44 = vadd.f32 %v2470_v2, %v2421_v13  ;;  %v2597_v62 = vadd.f32 %v4778_v3, %v2577_v11  ;;  %v2088_v45 = vpop.f32.mrf.mxu2 }
 0x290   : > { %v2532_v50 = vpop.f32.mrf.mxu1  ;;  %v2089_v26 = vadd.f32 %v2088_v45, %v4725_v53 }
 0x291   : > { %v2520_v1 = vadd.f32 %v2519_v60, %v2471_v44  ;;  %v2613_v41 = vmax.f32 %v2597_v62, 0.0  ;;  %v2434_v60 = vpop.f32.mrf.mxu3 }
 0x293   : > { %v2558_v18 = vadd.f32 %v2520_v1, %v2076_v28 }
 0x295   : > { %v2578_v19 = vmul.f32 %v4771_v16, %v2558_v18 }
 0x296   : > { %v2473_v5 = vpop.f32.mrf.mxu0 }
 0x297   : > { %v2598_v39 = vadd.f32 %v4778_v3, %v2578_v19  ;;  %v2474_v34 = vadd.f32 %v2473_v5, %v2424_v56  ;;  %v2090_v14 = vpop.f32.mrf.mxu2 }
 0x298   : > { %v2534_v6 = vpop.f32.mrf.mxu1 }
 0x299   : > { %v2614_v17 = vmax.f32 %v2598_v39, 0.0  ;;  %v2523_v15 = vadd.f32 %v2522_v35, %v2474_v34  ;;  %v2436_v20 = vpop.f32.mrf.mxu3 }
 0x29b   : > { %v2629_v55 = vpack.c.bf16 %v2614_v17, %v2613_v41  ;;  %v2559_v61 = vadd.f32 %v2523_v15, %v2079_v47  ;;  %v2091_v15 = vadd.f32 %v2090_v14, %v4729_v32 }
 0x29d   : > { %2709 = vmatmul.bf16.vlgmr.msra.gmra.mxu2 %v2629_v55  ;;  %v2579_v57 = vmul.f32 %v4771_v16, %v2559_v61 }
 0x29e   : > { %v2475_v59 = vpop.f32.mrf.mxu0 }
 0x29f   : > { %v2476_v31 = vadd.f32 %v2475_v59, %v2426_v12  ;;  %v2599_v46 = vadd.f32 %v4778_v3, %v2579_v57 }
 0x2a0   : > { %v2537_v5 = vpop.f32.mrf.mxu1 }
 0x2a1   : > { %v2525_v13 = vadd.f32 %v2524_v9, %v2476_v31  ;;  %v2615_v35 = vmax.f32 %v2599_v46, 0.0  ;;  %v2439_v1 = vpop.f32.mrf.mxu3 }
 0x2a3   : > { %v2560_v52 = vadd.f32 %v2525_v13, %v2081_v54 }
 0x2a5   : > { %v2580_v51 = vmul.f32 %v4771_v16, %v2560_v52 }
 0x2a6   : > { %v2478_v63 = vpop.f32.mrf.mxu0 }
 0x2a7   : > { %v2479_v0 = vadd.f32 %v2478_v63, %v2429_v27  ;;  %v2600_v56 = vadd.f32 %v4778_v3, %v2580_v51 }
 0x2a8   : > { %v2539_v61 = vpop.f32.mrf.mxu1 }
 0x2a9   : > { %v2528_v49 = vadd.f32 %v2527_v22, %v2479_v0  ;;  %v2616_v37 = vmax.f32 %v2600_v56, 0.0  ;;  %v2093_v22 = vpop.f32.mrf.mxu2  ;;  %v2441_v47 = vpop.f32.mrf.mxu3 }
 0x2aa   : > { %v2094_v32 = vadd.f32 %v2093_v22, %v4735_v43 }
 0x2ab   : > { %v2630_v29 = vpack.c.bf16 %v2616_v37, %v2615_v35  ;;  %v2561_v12 = vadd.f32 %v2528_v49, %v2084_v36 }
 0x2ad   : > { %2714 = vmatmul.bf16.gmra.mxu2 %v2630_v29  ;;  %v2581_v30 = vmul.f32 %v4771_v16, %v2561_v12 }
 0x2ae   : > { %v2480_v33 = vpop.f32.mrf.mxu0 }
 0x2af   : > { %v2481_v9 = vadd.f32 %v2480_v33, %v2431_v8  ;;  %v2601_v28 = vadd.f32 %v4778_v3, %v2581_v30 }
 0x2b0   : > { %v2542_v63 = vpop.f32.mrf.mxu1 }
 0x2b1   : > { %v2530_v2 = vadd.f32 %v2529_v23, %v2481_v9  ;;  %v2617_v62 = vmax.f32 %v2601_v28, 0.0  ;;  %v2095_v55 = vpop.f32.mrf.mxu2  ;;  %v2444_v51 = vpop.f32.mrf.mxu3 }
 0x2b2   : > { %v2096_v49 = vadd.f32 %v2095_v55, %v4739_v40 }
 0x2b3   : > { %v2562_v44 = vadd.f32 %v2530_v2, %v2086_v4 }
 0x2b5   : > { %v2582_v27 = vmul.f32 %v4771_v16, %v2562_v44 }
 0x2b6   : > { %v2483_v11 = vpop.f32.mrf.mxu0 }
 0x2b7   : > { %v2484_v24 = vadd.f32 %v2483_v11, %v2434_v60  ;;  %v2602_v38 = vadd.f32 %v4778_v3, %v2582_v27 }
 0x2b9   : > { %v2533_v18 = vadd.f32 %v2532_v50, %v2484_v24  ;;  %v2618_v19 = vmax.f32 %v2602_v38, 0.0  ;;  %v2098_v46 = vpop.f32.mrf.mxu2 }
 0x2ba   : > { %v2099_v40 = vadd.f32 %v2098_v46, %v4745_v48 }
 0x2bb   : > { %v2631_v39 = vpack.c.bf16 %v2618_v19, %v2617_v62  ;;  %v2563_v34 = vadd.f32 %v2533_v18, %v2089_v26 }
 0x2bd   : > { %2719 = vmatmul.bf16.gmra.mxu2 %v2631_v39  ;;  %v2583_v8 = vmul.f32 %v4771_v16, %v2563_v34 }
 0x2be   : > { %v2485_v41 = vpop.f32.mrf.mxu0 }
 0x2bf   : > { %v2486_v17 = vadd.f32 %v2485_v41, %v2436_v20  ;;  %v2603_v31 = vadd.f32 %v4778_v3, %v2583_v8  ;;  %v2446_v20 = vpop.f32.mrf.mxu3 }
 0x2c1   : > { %v2535_v58 = vadd.f32 %v2534_v6, %v2486_v17  ;;  %v2619_v52 = vmax.f32 %v2603_v31, 0.0  ;;  %v2100_v33 = vpop.f32.mrf.mxu2  ;;  %v2544_v6 = vpop.f32.mrf.mxu1 }
 0x2c3   : > { %v2564_v23 = vadd.f32 %v2535_v58, %v2091_v15 }
 0x2c5   : > { %v2584_v59 = vmul.f32 %v4771_v16, %v2564_v23 }
 0x2c6   : > { %v2488_v54 = vpop.f32.mrf.mxu0 }
 0x2c7   : > { %v2489_v53 = vadd.f32 %v2488_v54, %v2439_v1  ;;  %v2604_v57 = vadd.f32 %v4778_v3, %v2584_v59  ;;  %v2449_v24 = vpop.f32.mrf.mxu3  ;;  %v2101_v1 = vadd.f32 %v2100_v33, %v4749_v42 }
 0x2c9   : > { %v2538_v13 = vadd.f32 %v2537_v5, %v2489_v53  ;;  %v2620_v60 = vmax.f32 %v2604_v57, 0.0  ;;  %v2103_v38 = vpop.f32.mrf.mxu2  ;;  %v2547_v62 = vpop.f32.mrf.mxu1 }
 0x2ca   : > { %v2104_v42 = vadd.f32 %v2103_v38, %v4752_v21 }
 0x2cb   : > { %v2632_v45 = vpack.c.bf16 %v2620_v60, %v2619_v52  ;;  %v2565_v50 = vadd.f32 %v2538_v13, %v2094_v32 }
 0x2cd   : > { %2724 = vmatmul.bf16.gmra.mxu2 %v2632_v45  ;;  %v2585_v35 = vmul.f32 %v4771_v16, %v2565_v50 }
 0x2ce   : > { %v2490_v0 = vpop.f32.mrf.mxu0 }
 0x2cf   : > { %v2491_v56 = vadd.f32 %v2490_v0, %v2441_v47  ;;  %v2605_v12 = vadd.f32 %v4778_v3, %v2585_v35  ;;  %v2451_v8 = vpop.f32.mrf.mxu3 }
 0x2d1   : > { %v2540_v37 = vadd.f32 %v2539_v61, %v2491_v56  ;;  %v2621_v30 = vmax.f32 %v2605_v12, 0.0  ;;  %v2105_v58 = vpop.f32.mrf.mxu2  ;;  %v2549_v55 = vpop.f32.mrf.mxu1 }
 0x2d2   : > { %v2106_v31 = vadd.f32 %v2105_v58, %v4756_v7 }
 0x2d3   : > { %v2566_v36 = vadd.f32 %v2540_v37, %v2096_v49 }
 0x2d5   : > { %v2586_v29 = vmul.f32 %v4771_v16, %v2566_v36 }
 0x2d6   : > { %v2493_v43 = vpop.f32.mrf.mxu0 }
 0x2d7   : > { %v2494_v14 = vadd.f32 %v2493_v43, %v2444_v51  ;;  %v2606_v9 = vadd.f32 %v4778_v3, %v2586_v29  ;;  %v2454_v13 = vpop.f32.mrf.mxu3 }
 0x2d9   : > { %v2543_v4 = vadd.f32 %v2542_v63, %v2494_v14  ;;  %v2622_v2 = vmax.f32 %v2606_v9, 0.0  ;;  %v2108_v52 = vpop.f32.mrf.mxu2  ;;  %v2552_v45 = vpop.f32.mrf.mxu1 }
 0x2da   : > { %v2109_v7 = vadd.f32 %v2108_v52, %v4759_v25 }
 0x2db   : > { %v2633_v44 = vpack.c.bf16 %v2622_v2, %v2621_v30  ;;  %v2567_v27 = vadd.f32 %v2543_v4, %v2099_v40  ;;  %v4828_v40 = vld [vmem:[%s4936_s8] ss:$0 sm:$0xff] }
 0x2dd   : > { %2729 = vmatmul.bf16.gmra.mxu2 %v2633_v44  ;;  %v2587_v22 = vmul.f32 %v4771_v16, %v2567_v27  ;;  %v4834_v44 = vld [vmem:[%s4937_s9] ss:$0 sm:$0xff] }
 0x2de   : > { %v2495_v28 = vpop.f32.mrf.mxu0 }
 0x2df   : > { %v2496_v11 = vadd.f32 %v2495_v28, %v2446_v20  ;;  %v2607_v26 = vadd.f32 %v4778_v3, %v2587_v22  ;;  %v2456_v35 = vpop.f32.mrf.mxu3 }
 0x2e1   : > { %v2545_v18 = vadd.f32 %v2544_v6, %v2496_v11  ;;  %v2623_v17 = vmax.f32 %v2607_v26, 0.0  ;;  %v2110_v29 = vpop.f32.mrf.mxu2  ;;  %v2554_v12 = vpop.f32.mrf.mxu1 }
 0x2e2   : > { %v2111_v20 = vadd.f32 %v2110_v29, %v4765_v10  ;;  %v430_v10 = vld [vmem:[%s3986_s4] sm:$0xff]  }
 0x2e3   : > { %v2568_v19 = vadd.f32 %v2545_v18, %v2101_v1  ;;  %v2791_v22 = vunpack.c.h.bf16 %v430_v10 }
 0x2e5   : > { %v2588_v5 = vmul.f32 %v4771_v16, %v2568_v19  ;;  %v432_v19 = vld [vmem:[%s3986_s4 + $0x8] sm:$0xff]  }
 0x2e6   : > { %v2498_v39 = vpop.f32.mrf.mxu0  ;;  %v2793_v58 = vunpack.c.h.bf16 %v432_v19 }
 0x2e7   : > { %v2499_v48 = vadd.f32 %v2498_v39, %v2449_v24  ;;  %v2608_v34 = vadd.f32 %v4778_v3, %v2588_v5 }
 0x2e9   : > { %v2548_v41 = vadd.f32 %v2547_v62, %v2499_v48  ;;  %v2624_v15 = vmax.f32 %v2608_v34, 0.0  ;;  %v2792_v48 = vunpack.c.l.bf16 %v432_v19 }
 0x2eb   : > { %v2634_v47 = vpack.c.bf16 %v2624_v15, %v2623_v17  ;;  %v2569_v23 = vadd.f32 %v2548_v41, %v2104_v42 }
 0x2ed   : > { %2734 = vmatmul.bf16.gmra.mxu2 %v2634_v47  ;;  %v2589_v54 = vmul.f32 %v4771_v16, %v2569_v23 }
 0x2ee   : > { %v2500_v61 = vpop.f32.mrf.mxu0 }
 0x2ef   : > { %v2501_v59 = vadd.f32 %v2500_v61, %v2451_v8  ;;  %v2609_v32 = vadd.f32 %v4778_v3, %v2589_v54 }
 0x2f1   : > { %v2550_v53 = vadd.f32 %v2549_v55, %v2501_v59  ;;  %v2625_v63 = vmax.f32 %v2609_v32, 0.0  ;;  %v434_v55 = vld [vmem:[%s3986_s4 + $0x10] sm:$0xff]  }
 0x2f3   : > { %v2570_v57 = vadd.f32 %v2550_v53, %v2106_v31  ;;  %v2794_v31 = vunpack.c.l.bf16 %v434_v55 }
 0x2f5   : > { %v2590_v60 = vmul.f32 %v4771_v16, %v2570_v57 }
 0x2f6   : > { %v2503_v21 = vpop.f32.mrf.mxu0 }
 0x2f7   : > { %v2504_v51 = vadd.f32 %v2503_v21, %v2454_v13  ;;  %v2610_v46 = vadd.f32 %v4778_v3, %v2590_v60  ;;  %v2795_v60 = vunpack.c.h.bf16 %v434_v55  ;;  %v436_v21 = vld [vmem:[%s3986_s4 + $0x18] sm:$0xff]  }
 0x2f9   : > { %v2553_v50 = vadd.f32 %v2552_v45, %v2504_v51  ;;  %v2626_v0 = vmax.f32 %v2610_v46, 0.0 }
 0x2fb   : > { %v2635_v56 = vpack.c.bf16 %v2626_v0, %v2625_v63  ;;  %v2571_v49 = vadd.f32 %v2553_v50, %v2109_v7  ;;  %v2796_v63 = vunpack.c.l.bf16 %v436_v21 }
 0x2fd   : > { %2739 = vmatmul.bf16.gmra.mxu2 %v2635_v56  ;;  %v2591_v43 = vmul.f32 %v4771_v16, %v2571_v49 }
 0x2fe   : > { %v2505_v37 = vpop.f32.mrf.mxu0 }
 0x2ff   : > { %v2506_v36 = vadd.f32 %v2505_v37, %v2456_v35  ;;  %v2611_v25 = vadd.f32 %v4778_v3, %v2591_v43  ;;  %v2797_v37 = vunpack.c.h.bf16 %v436_v21 }
 0x301   : > { %v2555_v33 = vadd.f32 %v2554_v12, %v2506_v36  ;;  %v2627_v4 = vmax.f32 %v2611_v25, 0.0  ;;  %v438_v12 = vld [vmem:[%s3986_s4 + $0x20] sm:$0xff]  }
 0x303   : > { %v2572_v14 = vadd.f32 %v2555_v33, %v2111_v20 }
 0x305   : > { %v2592_v9 = vmul.f32 %v4771_v16, %v2572_v14  ;;  %v2798_v14 = vunpack.c.l.bf16 %v438_v12 }
 0x307   : > { %v2612_v6 = vadd.f32 %v4778_v3, %v2592_v9  ;;  %v2790_v3 = vunpack.c.l.bf16 %v430_v10 }
 0x309   : > { %v2628_v30 = vmax.f32 %v2612_v6, 0.0 }
 0x30b   : > { %v2636_v2 = vpack.c.bf16 %v2628_v30, %v2627_v4 }
 0x30d   : > { %2744 = vmatmul.bf16.gmra.mxu2 %v2636_v2  ;;  %v2799_v2 = vunpack.c.h.bf16 %v438_v12 }
 0x320   : > { %v2710_v16 = vpop.f32.mrf.mxu2 }
 0x321   : > { %v2754_v27 = vmul.f32 %v4828_v40, %v2710_v16 }
 0x323   : > { %v2774_v28 = vadd.f32 %v4834_v44, %v2754_v27  ;;  %v440_v27 = vld [vmem:[%s3986_s4 + $0x28] sm:$0xff]  }
 0x324   : > { %v2801_v19 = vunpack.c.h.bf16 %v440_v27 }
 0x325   : > { %v2806_v11 = vadd.f32 %v2790_v3, %v2774_v28 }
 0x327   : > { %v2822_v24 = vmax.f32 %v2806_v11, 0.0 }
 0x328   : > { %v2712_v38 = vpop.f32.mrf.mxu2 }
 0x329   : > { %2838 = vst [vmem:[%s4839_s19] sm:$0xff] %v2822_v24  ;;  %v2755_v1 = vmul.f32 %v4828_v40, %v2712_v38  ;;  %v2800_v24 = vunpack.c.l.bf16 %v440_v27 }
 0x32b   : > { %v2775_v18 = vadd.f32 %v4834_v44, %v2755_v1 }
 0x32d   : > { %v2807_v62 = vadd.f32 %v2791_v22, %v2775_v18 }
 0x32f   : > { %v2823_v5 = vmax.f32 %v2807_v62, 0.0 }
 0x330   : > { %v2715_v26 = vpop.f32.mrf.mxu2 }
 0x331   : > { %2839 = vst [vmem:[%s4839_s19 + $0x8] sm:$0xff] %v2823_v5  ;;  %v2756_v39 = vmul.f32 %v4828_v40, %v2715_v26 }
 0x333   : > { %v2776_v34 = vadd.f32 %v4834_v44, %v2756_v39  ;;  %v442_v39 = vld [vmem:[%s3986_s4 + $0x30] sm:$0xff]  }
 0x334   : > { %v2803_v55 = vunpack.c.h.bf16 %v442_v39 }
 0x335   : > { %v2808_v41 = vadd.f32 %v2792_v48, %v2776_v34 }
 0x337   : > { %v2824_v17 = vmax.f32 %v2808_v41, 0.0 }
 0x338   : > { %v2717_v15 = vpop.f32.mrf.mxu2 }
 0x339   : > { %2840 = vst [vmem:[%s4839_s19 + $0x10] sm:$0xff] %v2824_v17  ;;  %v2757_v8 = vmul.f32 %v4828_v40, %v2717_v15  ;;  %v2802_v17 = vunpack.c.l.bf16 %v442_v39 }
 0x33b   : > { %v2777_v42 = vadd.f32 %v4834_v44, %v2757_v8 }
 0x33d   : > { %v2809_v47 = vadd.f32 %v2793_v58, %v2777_v42 }
 0x33f   : > { %v2825_v23 = vmax.f32 %v2809_v47, 0.0 }
 0x340   : > { %v2720_v61 = vpop.f32.mrf.mxu2 }
 0x341   : > { %2841 = vst [vmem:[%s4839_s19 + $0x18] sm:$0xff] %v2825_v23  ;;  %v2758_v59 = vmul.f32 %v4828_v40, %v2720_v61 }
 0x343   : > { %v2778_v54 = vadd.f32 %v4834_v44, %v2758_v59  ;;  %v444_v59 = vld [vmem:[%s3986_s4 + $0x38] sm:$0xff]   ;;  %s2867_s4 = sshll.u32 %s4839_s19, 4  ;;  %s2868_s4 = int_to_ptr.vmem [resolvable:$true] %s2867_s4 }
 0x344   : > { %v2805_v21 = vunpack.c.h.bf16 %v444_v59 }
 0x345   : > { %v2810_v53 = vadd.f32 %v2794_v31, %v2778_v54 }
 0x347   : > { %v2826_v57 = vmax.f32 %v2810_v53, 0.0 }
 0x348   : > { %v2722_v13 = vpop.f32.mrf.mxu2 }
 0x349   : > { %2842 = vst [vmem:[%s4839_s19 + $0x20] sm:$0xff] %v2826_v57  ;;  %v2759_v52 = vmul.f32 %v4828_v40, %v2722_v13  ;;  %v2804_v57 = vunpack.c.l.bf16 %v444_v59 }
 0x34b   : > { %v2779_v32 = vadd.f32 %v4834_v44, %v2759_v52 }
 0x34d   : > { %v2811_v45 = vadd.f32 %v2795_v60, %v2779_v32 }
 0x34f   : > { %v2827_v51 = vmax.f32 %v2811_v45, 0.0 }
 0x350   : > { %v2725_v46 = vpop.f32.mrf.mxu2 }
 0x351   : > { %2843 = vst [vmem:[%s4839_s19 + $0x28] sm:$0xff] %v2827_v51  ;;  %v2760_v50 = vmul.f32 %v4828_v40, %v2725_v46 }
 0x353   : > { %v2780_v0 = vadd.f32 %v4834_v44, %v2760_v50 }
 0x355   : > { %v2812_v7 = vadd.f32 %v2796_v63, %v2780_v0 }
 0x357   : > { %v2828_v56 = vmax.f32 %v2812_v7, 0.0 }
 0x358   : > { %v2727_v49 = vpop.f32.mrf.mxu2 }
 0x359   : > { %2844 = vst [vmem:[%s4839_s19 + $0x30] sm:$0xff] %v2828_v56  ;;  %v2761_v35 = vmul.f32 %v4828_v40, %v2727_v49 }
 0x35b   : > { %v2781_v36 = vadd.f32 %v4834_v44, %v2761_v35 }
 0x35d   : > { %v2813_v29 = vadd.f32 %v2797_v37, %v2781_v36 }
 0x35f   : > { %v2829_v20 = vmax.f32 %v2813_v29, 0.0 }
 0x360   : > { %v2730_v43 = vpop.f32.mrf.mxu2 }
 0x361   : > { %2845 = vst [vmem:[%s4839_s19 + $0x38] sm:$0xff] %v2829_v20  ;;  %v2762_v33 = vmul.f32 %v4828_v40, %v2730_v43 }
 0x363   : > { %v2782_v9 = vadd.f32 %v4834_v44, %v2762_v33 }
 0x365   : > { %v2814_v25 = vadd.f32 %v2798_v14, %v2782_v9 }
 0x367   : > { %v2830_v6 = vmax.f32 %v2814_v25, 0.0 }
 0x368   : > { %v2732_v4 = vpop.f32.mrf.mxu2 }
 0x369   : > { %2846 = vst [vmem:[%s4839_s19 + $0x40] sm:$0xff] %v2830_v6  ;;  %v2763_v30 = vmul.f32 %v4828_v40, %v2732_v4 }
 0x36b   : > { %v2783_v10 = vadd.f32 %v4834_v44, %v2763_v30 }
 0x36d   : > { %v2815_v16 = vadd.f32 %v2799_v2, %v2783_v10 }
 0x36f   : > { %v2831_v3 = vmax.f32 %v2815_v16, 0.0 }
 0x370   : > { %v2735_v28 = vpop.f32.mrf.mxu2 }
 0x371   : > { %2847 = vst [vmem:[%s4839_s19 + $0x48] sm:$0xff] %v2831_v3  ;;  %v2764_v11 = vmul.f32 %v4828_v40, %v2735_v28 }
 0x373   : > { %v2784_v38 = vadd.f32 %v4834_v44, %v2764_v11 }
 0x375   : > { %v2816_v1 = vadd.f32 %v2800_v24, %v2784_v38 }
 0x377   : > { %v2832_v22 = vmax.f32 %v2816_v1, 0.0 }
 0x378   : > { %v2737_v18 = vpop.f32.mrf.mxu2 }
 0x379   : > { %2848 = vst [vmem:[%s4839_s19 + $0x50] sm:$0xff] %v2832_v22  ;;  %v2765_v62 = vmul.f32 %v4828_v40, %v2737_v18 }
 0x37b   : > { %v2785_v5 = vadd.f32 %v4834_v44, %v2765_v62 }
 0x37d   : > { %v2817_v26 = vadd.f32 %v2801_v19, %v2785_v5 }
 0x37f   : > { %v2833_v48 = vmax.f32 %v2817_v26, 0.0 }
 0x380   : > { %v2740_v34 = vpop.f32.mrf.mxu2 }
 0x381   : > { %2849 = vst [vmem:[%s4839_s19 + $0x58] sm:$0xff] %v2833_v48  ;;  %v2766_v41 = vmul.f32 %v4828_v40, %v2740_v34 }
 0x383   : > { %v2786_v15 = vadd.f32 %v4834_v44, %v2766_v41 }
 0x385   : > { %v2818_v8 = vadd.f32 %v2802_v17, %v2786_v15 }
 0x387   : > { %v2834_v58 = vmax.f32 %v2818_v8, 0.0 }
 0x388   : > { %v2742_v42 = vpop.f32.mrf.mxu2 }
 0x389   : > { %2850 = vst [vmem:[%s4839_s19 + $0x60] sm:$0xff] %v2834_v58  ;;  %v2767_v47 = vmul.f32 %v4828_v40, %v2742_v42 }
 0x38b   : > { %v2787_v23 = vadd.f32 %v4834_v44, %v2767_v47 }
 0x38d   : > { %v2819_v61 = vadd.f32 %v2803_v55, %v2787_v23 }
 0x38f   : > { %v2835_v31 = vmax.f32 %v2819_v61, 0.0 }
 0x390   : > { %v2745_v54 = vpop.f32.mrf.mxu2 }
 0x391   : > { %2851 = vst [vmem:[%s4839_s19 + $0x68] sm:$0xff] %v2835_v31  ;;  %v2768_v53 = vmul.f32 %v4828_v40, %v2745_v54 }
 0x393   : > { %v2788_v13 = vadd.f32 %v4834_v44, %v2768_v53 }
 0x395   : > { %v2820_v52 = vadd.f32 %v2804_v57, %v2788_v13 }
 0x397   : > { %v2836_v60 = vmax.f32 %v2820_v52, 0.0 }
 0x398   : > { %v2747_v32 = vpop.f32.mrf.mxu2 }
 0x399   : > { %2852 = vst [vmem:[%s4839_s19 + $0x70] sm:$0xff] %v2836_v60  ;;  %v2769_v45 = vmul.f32 %v4828_v40, %v2747_v32 }
 0x39b   : > { %v2789_v51 = vadd.f32 %v4834_v44, %v2769_v45 }
 0x39d   : > { %v2821_v46 = vadd.f32 %v2805_v21, %v2789_v51 }
 0x39f   : > { %v2837_v50 = vmax.f32 %v2821_v46, 0.0 }
 0x3a1   : > { %2853 = vst [vmem:[%s4839_s19 + $0x78] sm:$0xff] %v2837_v50 }
 0x3a2   : > { %3749 = shalt.err (!%p3746_p10)
}
 0x3a3   : > { %s3804_s1 = smov 128   ;;  %s3805_s19 = smov 8  }
 0x3a4   : > { %3528 = dma.vmem_to_hbm [thread:$0]  (%p3952_p3), %s2868_s4, 2048, %s2870_s22, %s2855_s17, %s3804_s1, %s3804_s1, %s3805_s19  }
 0x3a5 PF: > { %s2884_s24 = sand.u32 1, %s3784_s13   ;;  %p5058_p12 = scmp.ge.s32.totalorder %s3796_s16, 2 }
 0x3a6   : > { %s2885_s11 = scalar_lea.sflag [#allocation4], %s2884_s24 }
 0x3a7   : > { %p3545_p13 = pnand %p5058_p12, %p3896_p6 }
 0x3a9   : > { %p3546_p0 = pneg %p3545_p13 }
 0x3ab   : > { %3779 = dma.done.wait (%p3546_p0), %s2885_s11, 2048  }
 0x3ac   : > { %3781 = vsyncadd (%p3546_p0), %s2885_s11, 4294965248  ;;  %s5059_s12 = sld [smem:[#allocation15_spill]]  ;;  %p25_p5 = scmp.ge.s32.totalorder %s3934_s29, 4  }
 0x3ad   : > { %s5060_s13 = smov %s3788_s14  ;;  %s5061_s14 = smov %s3792_s15 }
 0x3ae   : > { %s5063_s16 = smov %s3934_s29  ;;  %27 = sbr.rel (!%p25_p5) target bundleno = 11 (0xb), region = 119 }
 0x3b2   : > { %s5062_s15 = smov %s5059_s12 }
 0x3b3   :  { %2891 = vsyncpa [#allocation3], 1 }
 0x3b4   :  { %2893 = vsyncpa [#allocation3 + $0x1], 1 }
 0x3b5   :  { %2894 = vsyncpa [#allocation6], 1 }
 0x3b6   :  { %2895 = vsyncpa [#allocation9], 1 }
 0x3b7   :  { %2896 = vsyncpa [#allocation4], 1 }
 0x3b8   :  { %2898 = vsyncpa [#allocation4 + $0x1], 1 }

</bundles_post_ra>
